<compile_context>
chip_gen: v7x
topology: tpu7x:2x2x1
jax: 0.10.0
libtpu: 0.0.40
codegen_flags: <defaults>
</compile_context>

<pallas_src>
import numpy as np
import jax
import jax.numpy as jnp
from jax import lax
from jax.experimental import pallas as pl
from jax.experimental.pallas import tpu as pltpu

# ---- small, module-consistent hyper-parameters ------------------------------
C_IN   = 1024          # fixed by ProtTransCNN (Conv1d in_channels, BatchNorm1d(1024))
ENC    = 128           # enc_dim  (conv out channels)
KSIZE  = 3             # in_ksize (odd -> 'same' pad = K//2 each side)
POOL   = 3             # nn.MaxPool1d(3): kernel = stride = 3
B      = 2
L      = 12            # sequence length (divisible by POOL, > KSIZE//2)
L_POOL = L // POOL
FLAT   = ENC * L_POOL  # fc_blks[0]
FC1    = 256           # fc_blks[1]
OUT    = 8             # out_dim
EPS    = 1e-5
PAD    = KSIZE // 2


# ---- the fused kernel (whole batch in one invocation) -----------------------
def prottrans_kernel(x_ref, gamma_ref, beta_ref, mean_ref, var_ref,
                     cw_ref, cb_ref, w1_ref, b1_ref, w2_ref, b2_ref,
                     out_ref):
    x = x_ref[...]                                         # (B, L, C_IN) f32

    # BatchNorm1d(1024), inference mode, folded to a per-channel scale/shift
    # (channels live on the lane axis).
    inv_std = lax.rsqrt(var_ref[...] + EPS)                # (1, C_IN)
    scale = (gamma_ref[...] * inv_std).reshape(1, 1, C_IN)
    shift = (beta_ref[...]
             - mean_ref[...] * gamma_ref[...] * inv_std).reshape(1, 1, C_IN)
    xbn = x * scale + shift                                # (B, L, C_IN) f32

    # Conv1d(1024 -> ENC, KSIZE, padding='same') as ONE im2col matmul.
    # Tap k reads xbn[:, l + k - PAD, :]; out-of-range rows are zero
    # ('same' zero padding), handled per batch element by the concat below.
    taps = []
    for k in range(KSIZE):
        s = PAD - k                                        # >0: shift down, <0: shift up
        if s == 0:
            taps.append(xbn)
        elif s > 0:
            zeros = jnp.zeros((B, s, C_IN), jnp.float32)
            taps.append(jnp.concatenate([zeros, xbn[:, :L - s, :]], axis=1))
        else:
            zeros = jnp.zeros((B, -s, C_IN), jnp.float32)
            taps.append(jnp.concatenate([xbn[:, -s:, :], zeros], axis=1))
    im2col = jnp.concatenate(taps, axis=-1)                # (B, L, KSIZE*C_IN)
    im2col = im2col.reshape(B * L, KSIZE * C_IN)
    conv = jnp.dot(im2col.astype(jnp.bfloat16), cw_ref[...],
                   preferred_element_type=jnp.float32)     # (B*L, ENC) f32
    y = jnp.maximum(conv + cb_ref[...], 0.0)               # conv bias + ReLU

    # MaxPool1d(3) over the sequence, then Flatten + fc_start as one matmul.
    pooled = y.reshape(B * L_POOL, POOL, ENC).max(axis=1)  # (B*L_POOL, ENC) f32
    flat = pooled.reshape(B, FLAT)                         # flat idx = l*ENC + c
    h = jnp.dot(flat.astype(jnp.bfloat16), w1_ref[...],
                preferred_element_type=jnp.float32) + b1_ref[...]
    h = jnp.maximum(h, 0.0)                                # fc_start bias + ReLU, (B, FC1)

    # fc_last (tiny; kept f32).  OUT=8 lowers to a masked store — negligible
    # at this size; pad/transpose the output only if OUT grows.
    out = jnp.dot(h, w2_ref[...], preferred_element_type=jnp.float32) + b2_ref[...]
    out_ref[...] = out.astype(out_ref.dtype)


# ---- wrapper: pallas_call plumbing ------------------------------------------
def prottrans_cnn(x, gamma, beta, mean, var, cw, cb, w1, b1, w2, b2):
    args = (x, gamma, beta, mean, var, cw, cb, w1, b1, w2, b2)

    def full(shape):
        n = len(shape)
        return pl.BlockSpec(shape, lambda i, n=n: (0,) * n)

    return pl.pallas_call(
        prottrans_kernel,
        out_shape=jax.ShapeDtypeStruct((B, OUT), jnp.float32),
        grid_spec=pltpu.PrefetchScalarGridSpec(
            num_scalar_prefetch=0,
            grid=(1,),                       # batch folded into a single step
            in_specs=[full(a.shape) for a in args],
            out_specs=full((B, OUT)),
        ),
        # Single grid step -> no megacore sharding (duplicated weight DMA on
        # v7x would outweigh the parallelism at this size).
        compiler_params=pltpu.CompilerParams(
            dimension_semantics=("arbitrary",)),
    )(*args)


# ---- pure-JAX reference mirroring the PyTorch module ------------------------
def ref_forward(x, gamma, beta, mean, var, w_conv, b_conv, w_fc1, b_fc1, w_fc2, b_fc2):
    xt = jnp.transpose(x, (0, 2, 1))                       # (B, 1024, L)
    xbn = ((xt - mean.reshape(1, C_IN, 1))
           / jnp.sqrt(var.reshape(1, C_IN, 1) + EPS)
           * gamma.reshape(1, C_IN, 1) + beta.reshape(1, C_IN, 1))
    y = lax.conv_general_dilated(xbn, w_conv, (1,), 'SAME',
                                 dimension_numbers=('NCH', 'OIH', 'NCH'),
                                 precision=lax.Precision.HIGHEST)
    y = jnp.maximum(y + b_conv.reshape(1, ENC, 1), 0.0)
    y = y[:, :, :L_POOL * POOL].reshape(B, ENC, L_POOL, POOL).max(axis=-1)
    flat = y.reshape(B, FLAT)                              # PyTorch Flatten order (c*L_POOL+l)
    h = jnp.maximum(jnp.dot(flat, w_fc1.T, precision=lax.Precision.HIGHEST) + b_fc1, 0.0)
    return jnp.dot(h, w_fc2.T, precision=lax.Precision.HIGHEST) + b_fc2


if __name__ == "__main__":
    key = jax.random.PRNGKey(0)
    ks = jax.random.split(key, 10)

    # input embedding (B, L, 1024)
    x = jax.random.normal(ks[0], (B, L, C_IN), jnp.float32)

    # BatchNorm1d(1024): affine + running stats (deterministic synthetic)
    gamma = 1.0 + 0.1 * jax.random.normal(ks[1], (1, C_IN), jnp.float32)
    beta  = 0.1 * jax.random.normal(ks[2], (1, C_IN), jnp.float32)
    mean  = 0.1 * jax.random.normal(ks[3], (1, C_IN), jnp.float32)
    var   = 1.0 + 0.1 * jnp.abs(jax.random.normal(ks[4], (1, C_IN), jnp.float32))

    # Conv1d(1024, ENC, KSIZE)  — PyTorch weight layout (ENC, 1024, K), kaiming-like scale
    w_conv = jax.random.normal(ks[5], (ENC, C_IN, KSIZE), jnp.float32) * np.sqrt(2.0 / (C_IN * KSIZE))
    b_conv = 0.01 * jax.random.normal(ks[6], (ENC,), jnp.float32)

    # fc_start: Linear(FLAT, FC1)  — PyTorch weight (FC1, FLAT), flat idx = c*L_POOL + l
    w_fc1 = jax.random.normal(ks[7], (FC1, FLAT), jnp.float32) * np.sqrt(2.0 / FLAT)
    b_fc1 = 0.01 * jax.random.normal(ks[8], (FC1,), jnp.float32)

    # fc_last: Linear(FC1, OUT)
    w_fc2 = jax.random.normal(ks[9], (OUT, FC1), jnp.float32) * np.sqrt(2.0 / FC1)
    b_fc2 = jnp.zeros((OUT,), jnp.float32)

    # --- glue: rearrange params to kernel layout (plain JAX) ---
    # conv: (ENC, C_IN, K) -> (K*C_IN, ENC), row = k*C_IN + c_in, stored bf16.
    cw = jnp.transpose(w_conv, (2, 1, 0)).reshape(KSIZE * C_IN, ENC).astype(jnp.bfloat16)
    cb = b_conv.reshape(1, ENC)
    # fc_start: permute columns from PyTorch flatten order (c*L_POOL + l) to
    # the kernel's pooled-flatten order (l*ENC + c), stored bf16.
    w1 = jnp.transpose(w_fc1.reshape(FC1, ENC, L_POOL), (2, 1, 0)).reshape(FLAT, FC1).astype(jnp.bfloat16)
    b1 = b_fc1.reshape(1, FC1)
    w2 = jnp.transpose(w_fc2)                                       # (FC1, OUT) f32 (tiny)
    b2 = b_fc2.reshape(1, OUT)

    out = prottrans_cnn(x, gamma, beta, mean, var, cw, cb, w1, b1, w2, b2)
    out = jax.block_until_ready(out)

    ref = ref_forward(x, gamma, beta, mean, var, w_conv, b_conv,
                      w_fc1, b_fc1, w_fc2, b_fc2)
    ref = jax.block_until_ready(ref)

    assert out.shape == (B, OUT)
    # bf16 weights + bf16 dot inputs (f32 accumulate) vs f32-HIGHEST reference.
    np.testing.assert_allclose(np.asarray(out), np.asarray(ref), atol=5e-2, rtol=5e-2)
    print("KERNEL_OK")
</pallas_src>

<mosaic_0001>
module attributes {stable_mosaic.version = 11 : i64} {
  func.func @prottrans_kernel(%arg0: i32, %arg1: memref<2x12x1024xf32, #tpu.memory_space<vmem>>, %arg2: memref<1x1024xf32, #tpu.memory_space<vmem>>, %arg3: memref<1x1024xf32, #tpu.memory_space<vmem>>, %arg4: memref<1x1024xf32, #tpu.memory_space<vmem>>, %arg5: memref<1x1024xf32, #tpu.memory_space<vmem>>, %arg6: memref<3072x128xbf16, #tpu.memory_space<vmem>>, %arg7: memref<1x128xf32, #tpu.memory_space<vmem>>, %arg8: memref<512x256xbf16, #tpu.memory_space<vmem>>, %arg9: memref<1x256xf32, #tpu.memory_space<vmem>>, %arg10: memref<256x8xf32, #tpu.memory_space<vmem>>, %arg11: memref<1x8xf32, #tpu.memory_space<vmem>>, %arg12: memref<2x8xf32, #tpu.memory_space<vmem>>) attributes {dimension_semantics = [#tpu.dimension_semantics<arbitrary>], iteration_bounds = array<i64: 1>, scalar_prefetch = 0 : i64, scratch_operands = 0 : i64, tpu.core_type = #tpu.core_type<tc>, window_params = [{pipeline_mode = #tpu.pipeline_mode<synchronous>, transform_indices = @transform_0, window_bounds = array<i64: 2, 12, 1024>}, {pipeline_mode = #tpu.pipeline_mode<synchronous>, transform_indices = @transform_1, window_bounds = array<i64: 1, 1024>}, {pipeline_mode = #tpu.pipeline_mode<synchronous>, transform_indices = @transform_2, window_bounds = array<i64: 1, 1024>}, {pipeline_mode = #tpu.pipeline_mode<synchronous>, transform_indices = @transform_3, window_bounds = array<i64: 1, 1024>}, {pipeline_mode = #tpu.pipeline_mode<synchronous>, transform_indices = @transform_4, window_bounds = array<i64: 1, 1024>}, {pipeline_mode = #tpu.pipeline_mode<synchronous>, transform_indices = @transform_5, window_bounds = array<i64: 3072, 128>}, {pipeline_mode = #tpu.pipeline_mode<synchronous>, transform_indices = @transform_6, window_bounds = array<i64: 1, 128>}, {pipeline_mode = #tpu.pipeline_mode<synchronous>, transform_indices = @transform_7, window_bounds = array<i64: 512, 256>}, {pipeline_mode = #tpu.pipeline_mode<synchronous>, transform_indices = @transform_8, window_bounds = array<i64: 1, 256>}, {pipeline_mode = #tpu.pipeline_mode<synchronous>, transform_indices = @transform_9, window_bounds = array<i64: 256, 8>}, {pipeline_mode = #tpu.pipeline_mode<synchronous>, transform_indices = @transform_10, window_bounds = array<i64: 1, 8>}, {pipeline_mode = #tpu.pipeline_mode<synchronous>, transform_indices = @transform_11, window_bounds = array<i64: 2, 8>}]} {
    %c0 = arith.constant 0 : index
    %c0_0 = arith.constant 0 : index
    %c0_1 = arith.constant 0 : index
    %0 = vector.load %arg1[%c0, %c0_0, %c0_1] : memref<2x12x1024xf32, #tpu.memory_space<vmem>>, vector<2x12x1024xf32>
    %c0_2 = arith.constant 0 : index
    %c0_3 = arith.constant 0 : index
    %1 = vector.load %arg5[%c0_2, %c0_3] : memref<1x1024xf32, #tpu.memory_space<vmem>>, vector<1x1024xf32>
    %cst = arith.constant 9.99999974E-6 : f32
    %2 = vector.broadcast %cst : f32 to vector<1x1024xf32>
    %3 = arith.addf %1, %2 : vector<1x1024xf32>
    %4 = math.rsqrt %3 : vector<1x1024xf32>
    %c0_4 = arith.constant 0 : index
    %c0_5 = arith.constant 0 : index
    %5 = vector.load %arg2[%c0_4, %c0_5] : memref<1x1024xf32, #tpu.memory_space<vmem>>, vector<1x1024xf32>
    %6 = arith.mulf %5, %4 : vector<1x1024xf32>
    %7 = vector.shape_cast %6 : vector<1x1024xf32> to vector<1x1x1024xf32>
    %c0_6 = arith.constant 0 : index
    %c0_7 = arith.constant 0 : index
    %8 = vector.load %arg3[%c0_6, %c0_7] : memref<1x1024xf32, #tpu.memory_space<vmem>>, vector<1x1024xf32>
    %c0_8 = arith.constant 0 : index
    %c0_9 = arith.constant 0 : index
    %9 = vector.load %arg4[%c0_8, %c0_9] : memref<1x1024xf32, #tpu.memory_space<vmem>>, vector<1x1024xf32>
    %c0_10 = arith.constant 0 : index
    %c0_11 = arith.constant 0 : index
    %10 = vector.load %arg2[%c0_10, %c0_11] : memref<1x1024xf32, #tpu.memory_space<vmem>>, vector<1x1024xf32>
    %11 = arith.mulf %9, %10 : vector<1x1024xf32>
    %12 = arith.mulf %11, %4 : vector<1x1024xf32>
    %13 = arith.subf %8, %12 : vector<1x1024xf32>
    %14 = vector.shape_cast %13 : vector<1x1024xf32> to vector<1x1x1024xf32>
    %15 = vector.broadcast %7 : vector<1x1x1024xf32> to vector<2x12x1024xf32>
    %16 = arith.mulf %0, %15 : vector<2x12x1024xf32>
    %17 = vector.broadcast %14 : vector<1x1x1024xf32> to vector<2x12x1024xf32>
    %18 = arith.addf %16, %17 : vector<2x12x1024xf32>
    %cst_12 = arith.constant 0.000000e+00 : f32
    %19 = vector.broadcast %cst_12 : f32 to vector<2x1x1024xf32>
    %20 = vector.extract_strided_slice %18 {offsets = [0, 0, 0], sizes = [2, 11, 1024], strides = [1, 1, 1]} : vector<2x12x1024xf32> to vector<2x11x1024xf32>
    %21 = tpu.concatenate %19, %20 in 1 : vector<2x1x1024xf32>, vector<2x11x1024xf32> -> vector<2x12x1024xf32>
    %cst_13 = arith.constant 0.000000e+00 : f32
    %22 = vector.broadcast %cst_13 : f32 to vector<2x1x1024xf32>
    %23 = vector.extract_strided_slice %18 {offsets = [0, 1, 0], sizes = [2, 11, 1024], strides = [1, 1, 1]} : vector<2x12x1024xf32> to vector<2x11x1024xf32>
    %24 = tpu.concatenate %23, %22 in 1 : vector<2x11x1024xf32>, vector<2x1x1024xf32> -> vector<2x12x1024xf32>
    %25 = tpu.concatenate %21, %18, %24 in 2 : vector<2x12x1024xf32>, vector<2x12x1024xf32>, vector<2x12x1024xf32> -> vector<2x12x3072xf32>
    %26 = vector.shape_cast %25 : vector<2x12x3072xf32> to vector<24x3072xf32>
    %27 = arith.truncf %26 : vector<24x3072xf32> to vector<24x3072xbf16>
    %c0_14 = arith.constant 0 : index
    %c0_15 = arith.constant 0 : index
    %28 = vector.load %arg6[%c0_14, %c0_15] : memref<3072x128xbf16, #tpu.memory_space<vmem>>, vector<3072x128xbf16>
    %cst_16 = arith.constant dense<0.000000e+00> : vector<24x128xf32>
    %29 = tpu.matmul %27, %28, %cst_16 {dimension_numbers = #tpu.dot_dimension_numbers<[1], [0], [0], [1], [0, 0, 1, 1], [], []>} : vector<24x3072xbf16>, vector<3072x128xbf16>, vector<24x128xf32> -> vector<24x128xf32>
    %c0_17 = arith.constant 0 : index
    %c0_18 = arith.constant 0 : index
    %30 = vector.load %arg7[%c0_17, %c0_18] : memref<1x128xf32, #tpu.memory_space<vmem>>, vector<1x128xf32>
    %31 = vector.broadcast %30 : vector<1x128xf32> to vector<24x128xf32>
    %32 = arith.addf %29, %31 : vector<24x128xf32>
    %cst_19 = arith.constant 0.000000e+00 : f32
    %33 = vector.broadcast %cst_19 : f32 to vector<24x128xf32>
    %34 = arith.maximumf %32, %33 : vector<24x128xf32>
    %35 = vector.shape_cast %34 : vector<24x128xf32> to vector<8x3x128xf32>
    %cst_20 = arith.constant dense<0xFF800000> : vector<8x128xf32>
    %36 = vector.multi_reduction <maximumf>, %35, %cst_20 [1] : vector<8x3x128xf32> to vector<8x128xf32>
    %37 = vector.shape_cast %36 : vector<8x128xf32> to vector<2x512xf32>
    %38 = arith.truncf %37 : vector<2x512xf32> to vector<2x512xbf16>
    %c0_21 = arith.constant 0 : index
    %c0_22 = arith.constant 0 : index
    %39 = vector.load %arg8[%c0_21, %c0_22] : memref<512x256xbf16, #tpu.memory_space<vmem>>, vector<512x256xbf16>
    %cst_23 = arith.constant dense<0.000000e+00> : vector<2x256xf32>
    %40 = tpu.matmul %38, %39, %cst_23 {dimension_numbers = #tpu.dot_dimension_numbers<[1], [0], [0], [1], [0, 0, 1, 1], [], []>} : vector<2x512xbf16>, vector<512x256xbf16>, vector<2x256xf32> -> vector<2x256xf32>
    %c0_24 = arith.constant 0 : index
    %c0_25 = arith.constant 0 : index
    %41 = vector.load %arg9[%c0_24, %c0_25] : memref<1x256xf32, #tpu.memory_space<vmem>>, vector<1x256xf32>
    %42 = vector.broadcast %41 : vector<1x256xf32> to vector<2x256xf32>
    %43 = arith.addf %40, %42 : vector<2x256xf32>
    %cst_26 = arith.constant 0.000000e+00 : f32
    %44 = vector.broadcast %cst_26 : f32 to vector<2x256xf32>
    %45 = arith.maximumf %43, %44 : vector<2x256xf32>
    %c0_27 = arith.constant 0 : index
    %c0_28 = arith.constant 0 : index
    %46 = vector.load %arg10[%c0_27, %c0_28] : memref<256x8xf32, #tpu.memory_space<vmem>>, vector<256x8xf32>
    %cst_29 = arith.constant dense<0.000000e+00> : vector<2x8xf32>
    %47 = tpu.matmul %45, %46, %cst_29 {dimension_numbers = #tpu.dot_dimension_numbers<[1], [0], [0], [1], [0, 0, 1, 1], [], []>} : vector<2x256xf32>, vector<256x8xf32>, vector<2x8xf32> -> vector<2x8xf32>
    %c0_30 = arith.constant 0 : index
    %c0_31 = arith.constant 0 : index
    %48 = vector.load %arg11[%c0_30, %c0_31] : memref<1x8xf32, #tpu.memory_space<vmem>>, vector<1x8xf32>
    %49 = vector.broadcast %48 : vector<1x8xf32> to vector<2x8xf32>
    %50 = arith.addf %47, %49 : vector<2x8xf32>
    %c0_32 = arith.constant 0 : index
    %c0_33 = arith.constant 0 : index
    %51 = vector.load %arg12[%c0_32, %c0_33] : memref<2x8xf32, #tpu.memory_space<vmem>>, vector<2x8xf32>
    tpu.vector_store %arg12[%c0_32, %c0_33], %50 {strides = array<i32>} : memref<2x8xf32, #tpu.memory_space<vmem>>, vector<2x8xf32>,
    return
  }
  func.func @transform_0(%arg0: i32) -> (i32, i32, i32) {
    %c0_i32 = arith.constant 0 : i32
    %c0_i32_0 = arith.constant 0 : i32
    %c0_i32_1 = arith.constant 0 : i32
    %c0_i32_2 = arith.constant 0 : i32
    return %c0_i32, %c0_i32_0, %c0_i32_1 : i32, i32, i32
  }
  func.func @transform_1(%arg0: i32) -> (i32, i32) {
    %c0_i32 = arith.constant 0 : i32
    %c0_i32_0 = arith.constant 0 : i32
    %c0_i32_1 = arith.constant 0 : i32
    return %c0_i32, %c0_i32_0 : i32, i32
  }
  func.func @transform_2(%arg0: i32) -> (i32, i32) {
    %c0_i32 = arith.constant 0 : i32
    %c0_i32_0 = arith.constant 0 : i32
    %c0_i32_1 = arith.constant 0 : i32
    return %c0_i32, %c0_i32_0 : i32, i32
  }
  func.func @transform_3(%arg0: i32) -> (i32, i32) {
    %c0_i32 = arith.constant 0 : i32
    %c0_i32_0 = arith.constant 0 : i32
    %c0_i32_1 = arith.constant 0 : i32
    return %c0_i32, %c0_i32_0 : i32, i32
  }
  func.func @transform_4(%arg0: i32) -> (i32, i32) {
    %c0_i32 = arith.constant 0 : i32
    %c0_i32_0 = arith.constant 0 : i32
    %c0_i32_1 = arith.constant 0 : i32
    return %c0_i32, %c0_i32_0 : i32, i32
  }
  func.func @transform_5(%arg0: i32) -> (i32, i32) {
    %c0_i32 = arith.constant 0 : i32
    %c0_i32_0 = arith.constant 0 : i32
    %c0_i32_1 = arith.constant 0 : i32
    return %c0_i32, %c0_i32_0 : i32, i32
  }
  func.func @transform_6(%arg0: i32) -> (i32, i32) {
    %c0_i32 = arith.constant 0 : i32
    %c0_i32_0 = arith.constant 0 : i32
    %c0_i32_1 = arith.constant 0 : i32
    return %c0_i32, %c0_i32_0 : i32, i32
  }
  func.func @transform_7(%arg0: i32) -> (i32, i32) {
    %c0_i32 = arith.constant 0 : i32
    %c0_i32_0 = arith.constant 0 : i32
    %c0_i32_1 = arith.constant 0 : i32
    return %c0_i32, %c0_i32_0 : i32, i32
  }
  func.func @transform_8(%arg0: i32) -> (i32, i32) {
    %c0_i32 = arith.constant 0 : i32
    %c0_i32_0 = arith.constant 0 : i32
    %c0_i32_1 = arith.constant 0 : i32
    return %c0_i32, %c0_i32_0 : i32, i32
  }
  func.func @transform_9(%arg0: i32) -> (i32, i32) {
    %c0_i32 = arith.constant 0 : i32
    %c0_i32_0 = arith.constant 0 : i32
    %c0_i32_1 = arith.constant 0 : i32
    return %c0_i32, %c0_i32_0 : i32, i32
  }
  func.func @transform_10(%arg0: i32) -> (i32, i32) {
    %c0_i32 = arith.constant 0 : i32
    %c0_i32_0 = arith.constant 0 : i32
    %c0_i32_1 = arith.constant 0 : i32
    return %c0_i32, %c0_i32_0 : i32, i32
  }
  func.func @transform_11(%arg0: i32) -> (i32, i32) {
    %c0_i32 = arith.constant 0 : i32
    %c0_i32_0 = arith.constant 0 : i32
    %c0_i32_1 = arith.constant 0 : i32
    return %c0_i32, %c0_i32_0 : i32, i32
  }
}

</mosaic_0001>

<bundles_post_ra>
// kernel: tpu_custom_call.1
= control target key start
LH: loop header
LB: loop body
LE: loop exit
PB: predicated region body
PF: predicated region fallthrough
CT: control target
= control target key end

     0   :  { %16 = vsyncpa [#allocation3], 0  ;;  %s6168_s0 = inlined_call_operand.vmem [shape: f32[2,12,1024], index: 0, kind: input, shape index: {}]   ;;  %s6169_s1 = inlined_call_operand.vmem [shape: f32[1,1024], index: 1, kind: input, shape index: {}]   ;;  %s6170_s2 = inlined_call_operand.vmem [shape: f32[1,1024], index: 2, kind: input, shape index: {}]   ;;  %s6171_s3 = inlined_call_operand.vmem [shape: f32[1,1024], index: 3, kind: input, shape index: {}]   ;;  %s6172_s4 = inlined_call_operand.vmem [shape: f32[1,1024], index: 4, kind: input, shape index: {}]   ;;  %s6173_s5 = inlined_call_operand.hbm [shape: bf16[3072,128], index: 5, kind: input, shape index: {}]   ;;  %s6174_s6 = inlined_call_operand.vmem [shape: f32[1,128], index: 6, kind: input, shape index: {}]   ;;  %s6175_s7 = inlined_call_operand.vmem [shape: bf16[512,256], index: 7, kind: input, shape index: {}]   ;;  %s6176_s8 = inlined_call_operand.vmem [shape: f32[1,256], index: 8, kind: input, shape index: {}]   ;;  %s6177_s9 = inlined_call_operand.vmem [shape: f32[256,8], index: 9, kind: input, shape index: {}]   ;;  %s6178_s10 = inlined_call_operand.vmem [shape: f32[1,8], index: 10, kind: input, shape index: {}]   ;;  %s6179_s11 = inlined_call_operand.hbm [shape: f32[2,8], index: 11, kind: output, shape index: {}]  }
   0x1   :  { %17 = vsyncpa [#allocation4], 0  ;;  %s5008_s17 = smov [#allocation2]   ;;  %s4960_s21 = scalar_lea.hbm %s6173_s5, 24576 }
   0x2   :  { %s33_s18 = sshll.u32 %s5008_s17, 4  ;;  %p4961_p0 = scmp.ne.s32.totalorder %s6173_s5, %s4960_s21  ;;  %s34_s18 = int_to_ptr.vmem [resolvable:$true] %s33_s18 }
   0x3   :  { %p4964_p1 = scmp.lt.u32.totalorder %s4960_s21, %s6173_s5 }
   0x5   :  { %p4966_p2 = pnand %p4964_p1, %p4961_p0 }
   0x7   :  { %4969 = shalt.err (!%p4966_p2)
}
   0x8   :  { %s4970_s26 = scalar_lea.vmem %s34_s18, 24576  ;;  %p4975_p4 = scmp.lt.s32.totalorder %s34_s18, %s34_s18 }
   0x9   :  { %p4971_p3 = scmp.ne.s32.totalorder %s34_s18, %s4970_s26  ;;  %p4976_p5 = scmp.lt.s32.totalorder %s4970_s26, %s4970_s26 }
   0xb   :  { %p4977_p6 = por %p4976_p5, %p4975_p4 }
   0xd   :  { %p4978_p7 = pnand %p4977_p6, %p4971_p3 }
   0xf   :  { %4981 = shalt.err (!%p4978_p7)
}
  0x10   :  { %s5009_s27 = smov 64   ;;  %s5010_s28 = smov 4  }
  0x11   :  { %39 = dma.hbm_to_vmem [thread:$0]  %s6173_s5, 24576, %s34_s18, [#allocation3], %s5009_s27, %s5009_s27, %s5010_s28  }
  0x12   :  { %5004 = dma.done.wait [#allocation3], 24576  }
  0x13   :  { %5005 = vsyncadd [#allocation3], 4294942720  ;;  %v4670_v0 = vld [vmem:[#allocation2 + $0x40] sm:$0xff]   ;;  %v4674_v4 = vld [vmem:[#allocation2 + $0x48] sm:$0xff]   ;;  %v97_v34 = vlaneseq  ;;  %vm274_vm0 = vcmask 1040384   ;;  %vm5011_vm2 = vmmov 1  }
  0x14   :  { %v4671_v1 = vld [vmem:[#allocation2 + $0xc0] sm:$0xff]   ;;  %4255 = vmatprep.subr.bf16.mxu0 %v4670_v0  ;;  %v4675_v5 = vld [vmem:[#allocation2 + $0xc8] sm:$0xff]   ;;  %v4678_v8 = vld [vmem:[#allocation2 + $0x50] sm:$0xff]   ;;  %vm355_vm4 = vcmask 1046528   ;;  %vm420_vm5 = vcmask 1042432   ;;  %vm3261_vm6 = vcmask 1041409  }
  0x15   :  { %v4672_v2 = vld [vmem:[#allocation2] sm:$0xff]   ;;  %4283 = vmatprep.subr.bf16.mxu1 %v4671_v1  ;;  %v4676_v6 = vld [vmem:[#allocation2 + $0x8] sm:$0xff]   ;;  %v4679_v9 = vld [vmem:[#allocation2 + $0xd0] sm:$0xff]   ;;  %v5094_v37 = vshrl.u32 %v97_v34, 7  ;;  %vm3263_vm7 = vcmask 1042434   ;;  %vm3265_vm8 = vcmask 1043459  }
  0x16   :  { %v4673_v3 = vld [vmem:[#allocation2 + $0x80] sm:$0xff]   ;;  %4256 = vmatpush3.bf16.msra.mxu0 %v4672_v2  ;;  %v4677_v7 = vld [vmem:[#allocation2 + $0x88] sm:$0xff]   ;;  %v4680_v10 = vld [vmem:[#allocation2 + $0x10] sm:$0xff]   ;;  %vm3267_vm9 = vcmask 1044484   ;;  %vm3269_vm10 = vcmask 1045509   ;;  %vm3271_vm11 = vcmask 1046534  }
  0x17   :  { %4284 = vmatpush3.bf16.msra.mxu1 %v4673_v3  ;;  %4257 = vmatprep.subr.bf16.mxu0 %v4674_v4  ;;  %v4681_v11 = vld [vmem:[#allocation2 + $0x90] sm:$0xff]   ;;  %v4682_v12 = vld [vmem:[#allocation2 + $0x58] sm:$0xff]   ;;  %v4686_v16 = vld [vmem:[#allocation2 + $0x60] sm:$0xff]   ;;  %6188 = vst [vmem:[#allocation8_spill] sm:$0xff] %v5094_v37  ;;  %v5100_v41 = vsub.s32 1, %v5094_v37  ;;  %v111_v42 = vsub.s32 3, %v5094_v37 }
  0x18   :  { %4285 = vmatprep.subr.bf16.mxu1 %v4675_v5  ;;  %v4683_v13 = vld [vmem:[#allocation2 + $0xd8] sm:$0xff]   ;;  %v4687_v17 = vld [vmem:[#allocation2 + $0xe0] sm:$0xff]   ;;  %v4690_v20 = vld [vmem:[#allocation2 + $0x68] sm:$0xff]   ;;  %v5104_v43 = vsub.s32 0, %v5094_v37  ;;  %v107_v44 = vsub.s32 2, %v5094_v37  ;;  %v119_v45 = vsub.s32 5, %v5094_v37 }
  0x19   :  { %v4684_v14 = vld [vmem:[#allocation2 + $0x18] sm:$0xff]   ;;  %v4688_v18 = vld [vmem:[#allocation2 + $0x20] sm:$0xff]   ;;  %v4691_v21 = vld [vmem:[#allocation2 + $0xe8] sm:$0xff]   ;;  %6189 = vst [vmem:[#allocation9_spill] sm:$0xff] %v5100_v41  ;;  %v127_v51 = vsub.s32 7, %v5094_v37  ;;  %v115_v55 = vsub.s32 4, %v5094_v37 }
  0x1a   :  { %4258 = vmatpush3.bf16.msra.mxu0 %v4676_v6  ;;  %v4685_v15 = vld [vmem:[#allocation2 + $0x98] sm:$0xff]   ;;  %v4689_v19 = vld [vmem:[#allocation2 + $0xa0] sm:$0xff]   ;;  %v4692_v22 = vld [vmem:[#allocation2 + $0x28] sm:$0xff]   ;;  %6190 = vst [vmem:[#allocation10_spill] sm:$0xff] %v5104_v43  ;;  %v123_v1 = vsub.s32 6, %v5094_v37  ;;  %vm3273_vm12 = vcmask 1047559  }
  0x1b   :  { %4286 = vmatpush3.bf16.msra.mxu1 %v4677_v7  ;;  %4259 = vmatprep.subr.bf16.mxu0 %v4678_v8  ;;  %v4693_v23 = vld [vmem:[#allocation2 + $0xa8] sm:$0xff]   ;;  %v4694_v24 = vld [vmem:[#allocation2 + $0x70] sm:$0xff]   ;;  %v4698_v28 = vld [vmem:[#allocation2 + $0x78] sm:$0xff]   ;;  %s5015_s17 = smov [#allocation5]   ;;  %vm3898_vm13 = vcmask 58368  }
  0x1c   :  { %4287 = vmatprep.subr.bf16.mxu1 %v4679_v9  ;;  %v4695_v25 = vld [vmem:[#allocation2 + $0xf0] sm:$0xff]   ;;  %v4699_v29 = vld [vmem:[#allocation2 + $0xf8] sm:$0xff]   ;;  %v86_v32 = vld [vmem:[%s6172_s4] sm:$0xff]  ;;  %s3906_s18 = sshll.u32 %s5015_s17, 4  ;;  %s3907_s18 = int_to_ptr.vmem [resolvable:$true] %s3906_s18 }
  0x1d   :  { %v4696_v26 = vld [vmem:[#allocation2 + $0x30] sm:$0xff]   ;;  %v4700_v30 = vld [vmem:[#allocation2 + $0x38] sm:$0xff]   ;;  %v87_v33 = vadd.f32 1e-05, %v86_v32  ;;  %v89_v35 = vld [vmem:[%s6169_s1] sm:$0xff]  ;;  %s4982_s19 = scalar_lea.vmem %s3907_s18, 32  ;;  %p4987_p9 = scmp.lt.s32.totalorder %s3907_s18, %s3907_s18 }
  0x1e   :  { %4260 = vmatpush3.bf16.msra.mxu0 %v4680_v10  ;;  %v4697_v27 = vld [vmem:[#allocation2 + $0xb0] sm:$0xff]   ;;  %v4701_v31 = vld [vmem:[#allocation2 + $0xb8] sm:$0xff]   ;;  %v4702_v36 = vld [vmem:[#allocation2 + $0x140] sm:$0xff]   ;;  %p4983_p8 = scmp.ne.s32.totalorder %s3907_s18, %s4982_s19  ;;  %p4988_p10 = scmp.lt.s32.totalorder %s4982_s19, %s4982_s19 }
  0x1f   :  { %4288 = vmatpush3.bf16.msra.mxu1 %v4681_v11  ;;  %4261 = vmatprep.subr.bf16.mxu0 %v4682_v12  ;;  %4958 = vrsqrt.f32 %v87_v33  ;;  %v4703_v38 = vld [vmem:[#allocation2 + $0x1c0] sm:$0xff]   ;;  %v55_v47 = vld [vmem:[%s6168_s0 + $0x8] sm:$0xff]  ;;  %v57_v54 = vld [vmem:[%s6168_s0 + $0x18] sm:$0xff] }
  0x20   :  { %4289 = vmatprep.subr.bf16.mxu1 %v4683_v13  ;;  %v92_v39 = vld [vmem:[%s6171_s3] sm:$0xff]  ;;  %v63_v48 = vld [vmem:[%s6168_s0 + $0x48] sm:$0xf]  ;;  %v65_v56 = vld [vmem:[%s6168_s0 + $0x58] sm:$0xf]  ;;  %p4989_p11 = por %p4988_p10, %p4987_p9 }
  0x21   :  { %v93_v40 = vmul.f32 %v92_v39, %v89_v35  ;;  %v71_v49 = vld [vmem:[%s6168_s0 + $0x88] sm:$0xff]  ;;  %v91_v50 = vld [vmem:[%s6170_s2] sm:$0xff]  ;;  %v73_v59 = vld [vmem:[%s6168_s0 + $0x98] sm:$0xff] }
  0x22   :  { %4262 = vmatpush3.bf16.msra.mxu0 %v4684_v14  ;;  %v54_v62 = vld [vmem:[%s6168_s0] sm:$0xff]  ;;  %vm5205_vm1 = vmneg %vm274_vm0  ;;  %p4990_p12 = pnand %p4989_p11, %p4983_p8 }
  0x23   :  { %4290 = vmatpush3.bf16.msra.mxu1 %v4685_v15  ;;  %4263 = vmatprep.subr.bf16.mxu0 %v4686_v16  ;;  %v62_v6 = vld [vmem:[%s6168_s0 + $0x40] sm:$0xf]  ;;  %v56_v16 = vld [vmem:[%s6168_s0 + $0x10] sm:$0xff]  ;;  %vm5236_vm3 = vmpackc.low %vm5011_vm2, %vm5205_vm1 }
  0x24   :  { %4291 = vmatprep.subr.bf16.mxu1 %v4687_v17  ;;  %v70_v11 = vld [vmem:[%s6168_s0 + $0x80] sm:$0xff] }
  0x26   :  { %4264 = vmatpush3.bf16.msra.mxu0 %v4688_v18 }
  0x27   :  { %4292 = vmatpush3.bf16.msra.mxu1 %v4689_v19  ;;  %4265 = vmatprep.subr.bf16.mxu0 %v4690_v20 }
  0x28   :  { %4293 = vmatprep.subr.bf16.mxu1 %v4691_v21  ;;  %v64_v21 = vld [vmem:[%s6168_s0 + $0x50] sm:$0xf] }
  0x29   :  { %v4959_v46 = vpop.eup %4958 }
  0x2a   :  { %4266 = vmatpush3.bf16.msra.mxu0 %v4692_v22  ;;  %v5121_v52 = vmul.f32 %v4959_v46, %v89_v35  ;;  %v94_v53 = vmul.f32 %v4959_v46, %v93_v40 }
  0x2b   :  { %4294 = vmatpush3.bf16.msra.mxu1 %v4693_v23  ;;  %4267 = vmatprep.subr.bf16.mxu0 %v4694_v24 }
  0x2c   :  { %4295 = vmatprep.subr.bf16.mxu1 %v4695_v25  ;;  %v5130_v57 = vsub.f32 %v91_v50, %v94_v53  ;;  %v5134_v58 = vrot.slane %v5121_v52, %v5100_v41  ;;  %v5140_v60 = vrot.slane %v5121_v52, %v111_v42  ;;  %v100_v61 = vrot.slane %v5121_v52, %v5104_v43 }
  0x2d   :  { %v5150_v63 = vrot.slane %v5121_v52, %v107_v44  ;;  %v5155_v0 = vrot.slane %v5121_v52, %v119_v45 }
  0x2e   :  { %4268 = vmatpush3.bf16.msra.mxu0 %v4696_v26  ;;  %v138_v2 = vmul.f32 %v5134_v58, %v55_v47  ;;  %v146_v3 = vmul.f32 %v5134_v58, %v63_v48  ;;  %v154_v4 = vmul.f32 %v5134_v58, %v71_v49  ;;  %v5163_v5 = vrot.slane %v5130_v57, %v5100_v41  ;;  %v4704_v26 = vld [vmem:[#allocation2 + $0x100] sm:$0xff]   ;;  %v4732_v41 = vld [vmem:[#allocation2 + $0x138] sm:$0xff]  }
  0x2f   :  { %4296 = vmatpush3.bf16.msra.mxu1 %v4697_v27  ;;  %4269 = vmatprep.subr.bf16.mxu0 %v4698_v28  ;;  %v140_v7 = vmul.f32 %v5140_v60, %v57_v54  ;;  %v148_v8 = vmul.f32 %v5140_v60, %v65_v56  ;;  %v156_v9 = vmul.f32 %v5140_v60, %v73_v59  ;;  %v78_v56 = vld [vmem:[%s6168_s0 + $0xc0] sm:$0xf]  ;;  %v79_v59 = vld [vmem:[%s6168_s0 + $0xc8] sm:$0xf] }
  0x30   :  { %4297 = vmatprep.subr.bf16.mxu1 %v4699_v29  ;;  %v5172_v10 = vrot.slane %v5130_v57, %v111_v42  ;;  %v5178_v12 = vadd.f32 %v5163_v5, %v138_v2  ;;  %v5181_v13 = vadd.f32 %v5163_v5, %v146_v3  ;;  %v5184_v14 = vadd.f32 %v5163_v5, %v154_v4 }
  0x31   :  { %v137_v15 = vmul.f32 %v100_v61, %v54_v62  ;;  %v145_v20 = vmul.f32 %v100_v61, %v62_v6  ;;  %v153_v25 = vmul.f32 %v100_v61, %v70_v11  ;;  %v139_v34 = vmul.f32 %v5150_v63, %v56_v16 }
  0x32   :  { %4270 = vmatpush3.bf16.msra.mxu0 %v4700_v30  ;;  %v5190_v17 = vadd.f32 %v5172_v10, %v140_v7  ;;  %v5193_v18 = vadd.f32 %v5172_v10, %v148_v8  ;;  %v5196_v19 = vadd.f32 %v5172_v10, %v156_v9  ;;  %v276_v22 = vrot.slane %v5178_v12, 7 }
  0x33   :  { %4298 = vmatpush3.bf16.msra.mxu1 %v4701_v31  ;;  %4311 = vmatprep.subr.bf16.mxu0 %v4702_v36  ;;  %v285_v23 = vrot.slane %v5181_v13, 7  ;;  %v300_v24 = vrot.slane %v5184_v14, 7  ;;  %v173_v30 = vrot.slane %v5130_v57, %v5104_v43  ;;  %v72_v31 = vld [vmem:[%s6168_s0 + $0x90] sm:$0xff]  ;;  %v147_v35 = vmul.f32 %v5150_v63, %v64_v21 }
  0x34   :  { %4339 = vmatprep.subr.bf16.mxu1 %v4703_v38  ;;  %v278_v27 = vrot.slane %v5190_v17, 7  ;;  %v289_v28 = vrot.slane %v5193_v18, 7  ;;  %v302_v29 = vrot.slane %v5196_v19, 7  ;;  %v155_v49 = vmul.f32 %v5150_v63, %v72_v31 }
  0x35   :  { %v286_v32 = vsel %vm274_vm0, %v276_v22, %v285_v23  ;;  %v5221_v33 = vsel %vm274_vm0, 0.0, %v300_v24  ;;  %v5232_v40 = vadd.f32 %v173_v30, %v137_v15  ;;  %v5241_v47 = vadd.f32 %v173_v30, %v145_v20  ;;  %v81_v20 = vld [vmem:[%s6168_s0 + $0xd8] sm:$0xf] }
  0x36   :  { %v3916_v36 = vcombine.low %v286_v32, %v5221_v33  ;;  %v290_v38 = vsel %vm274_vm0, %v278_v27, %v289_v28  ;;  %v5230_v39 = vsel %vm274_vm0, 0.0, %v302_v29  ;;  %v5243_v48 = vadd.f32 %v173_v30, %v153_v25 }
  0x37   :  { %v3918_v46 = vcombine.low %v290_v38, %v5230_v39  ;;  %v275_v53 = vrot.slane %v5232_v40, 7  ;;  %v181_v54 = vrot.slane %v5130_v57, %v107_v44  ;;  %v5259_v62 = vrot.slane %v5121_v52, %v127_v51  ;;  %v4706_v38 = vld [vmem:[#allocation2 + $0x148] sm:$0xff]  }
  0x38   :  { %v4158_v50 = vpack.c.bf16 %v3916_v36, %v276_v22  ;;  %v283_v3 = vrot.slane %v5241_v47, 7  ;;  %v299_v4 = vrot.slane %v5243_v48, 7  ;;  %v161_v6 = vmul.f32 %v100_v61, %v78_v56  ;;  %v80_v61 = vld [vmem:[%s6168_s0 + $0xd0] sm:$0xf]  ;;  %v4705_v36 = vld [vmem:[#allocation2 + $0x180] sm:$0xff]  }
  0x39   :  { %v4166_v2 = vpack.c.bf16 %v3918_v46, %v278_v27  ;;  %v5265_v44 = vadd.f32 %v181_v54, %v139_v34  ;;  %v5267_v7 = vadd.f32 %v181_v54, %v147_v35  ;;  %v5269_v8 = vadd.f32 %v181_v54, %v155_v49 }
  0x3a   :  { %4159 = vmatprep.mubr.msk.bf16.mxu0 %vm5236_vm3, %v4158_v50  ;;  %v162_v9 = vmul.f32 %v5134_v58, %v79_v59  ;;  %v284_v11 = vsel %vm274_vm0, %v275_v53, %v283_v3  ;;  %v347_v15 = vsel %vm274_vm0, 0.0, %v299_v4  ;;  %v5276_v16 = vadd.f32 %v173_v30, %v161_v6  ;;  %v4707_v50 = vld [vmem:[#allocation2 + $0x1c8] sm:$0xff]  }
  0x3b   :  { %4167 = vmatprep.mubr.msk.bf16.mxu1 %vm5236_vm3, %v4166_v2  ;;  %v5287_v58 = vrot.slane %v5121_v52, %v115_v55  ;;  %v3915_v21 = vcombine.low %v284_v11, %v347_v15  ;;  %v277_v22 = vrot.slane %v5265_v44, 7  ;;  %v287_v23 = vrot.slane %v5267_v7, 7  ;;  %v4710_v11 = vld [vmem:[#allocation2 + $0x150] sm:$0xff]  }
  0x3c   :  { %v301_v25 = vrot.slane %v5269_v8, 7  ;;  %v5293_v27 = vadd.f32 %v5163_v5, %v162_v9  ;;  %v307_v28 = vrot.slane %v5276_v16, 7  ;;  %v506_v30 = vcombine.high %v347_v15, %v5221_v33  ;;  %v4709_v9 = vld [vmem:[#allocation2 + $0x188] sm:$0xff]  }
  0x3d   :  { %v163_v31 = vmul.f32 %v5150_v63, %v80_v61  ;;  %v4162_v32 = vpack.c.bf16 %v3915_v21, %v275_v53  ;;  %v288_v34 = vsel %vm274_vm0, %v277_v22, %v287_v23  ;;  %v164_v46 = vmul.f32 %v5140_v60, %v81_v20  ;;  %v4712_v20 = vld [vmem:[#allocation2 + $0x110] sm:$0xff]  }
  0x3e   :  { %v349_v35 = vsel %vm274_vm0, 0.0, %v301_v25  ;;  %v308_v5 = vsel %vm274_vm0, %v299_v4, %v307_v28  ;;  %v309_v56 = vrot.slane %v5293_v27, 7  ;;  %v5316_v60 = vrot.slane %v5130_v57, %v119_v45  ;;  %v4708_v4 = vld [vmem:[#allocation2 + $0x108] sm:$0xff]  }
  0x3f   :  { %v3917_v49 = vcombine.low %v288_v34, %v349_v35  ;;  %v5303_v59 = vadd.f32 %v181_v54, %v163_v31  ;;  %4163 = vmatmul.mubr.msk.bf16.vlgmr.msra.gmra.mrb[0].mxu0 %vm5236_vm3, %v4162_v32  ;;  %v5307_v63 = vcombine.low %v506_v30, %v308_v5  ;;  %v5310_v53 = vadd.f32 %v5172_v10, %v164_v46  ;;  %v61_v32 = vld [vmem:[%s6168_s0 + $0x38] sm:$0xff] }
  0x40   :  { %v508_v2 = vcombine.high %v349_v35, %v5230_v39  ;;  %4312 = vmatpush3.bf16.msra.mxu0 %v4704_v26  ;;  %v310_v54 = vsel %vm274_vm0, %v300_v24, %v309_v56  ;;  %v5325_v10 = vrot.slane %v5130_v57, %v127_v51  ;;  %v5331_v61 = vrot.slane %v5130_v57, %v115_v55  ;;  %v4711_v51 = vld [vmem:[#allocation2 + $0x1d0] sm:$0xff]   ;;  %v69_v34 = vld [vmem:[%s6168_s0 + $0x78] sm:$0xf] }
  0x41   :  { %v4170_v3 = vpack.c.bf16 %v3917_v49, %v277_v22  ;;  %v311_v6 = vrot.slane %v5303_v59, 7  ;;  %4313 = vmatprep.subr.bf16.mxu0 %v4706_v38  ;;  %v529_v15 = vcombine.low %v308_v5, %v310_v54  ;;  %v313_v45 = vrot.slane %v5310_v53, 7  ;;  %v77_v35 = vld [vmem:[%s6168_s0 + $0xb8] sm:$0xff] }
  0x42   :  { %v5336_v24 = vrot.slane %v5121_v52, %v123_v1  ;;  %v709_v21 = vpack.c.bf16 %v5307_v63, %v5307_v63  ;;  %v5346_v55 = vrot.slane %v5130_v57, %v123_v1  ;;  %v3923_v23 = vcombine.low %v5241_v47, %v5243_v48  ;;  %v67_v57 = vld [vmem:[%s6168_s0 + $0x68] sm:$0xf]  ;;  %v4714_v38 = vld [vmem:[#allocation2 + $0x158] sm:$0xff]  }
  0x43   :  { %4171 = vmatmul.mubr.msk.bf16.vlgmr.msra.gmra.mrb[0].mxu1 %vm5236_vm3, %v4170_v3  ;;  %v312_v22 = vsel %vm274_vm0, %v301_v25, %v311_v6  ;;  %v3940_v52 = vcombine.high %v5221_v33, %v529_v15  ;;  %v314_v26 = vsel %vm274_vm0, %v302_v29, %v313_v45  ;;  %v59_v25 = vld [vmem:[%s6168_s0 + $0x28] sm:$0xff]  ;;  %v150_v31 = vmul.f32 %v5155_v0, %v67_v57  ;;  %v4715_v56 = vld [vmem:[#allocation2 + $0x1d8] sm:$0xff]   ;;  %v58_v6 = vld [vmem:[%s6168_s0 + $0x20] sm:$0xff] }
  0x44   :  { %4340 = vmatpush3.bf16.msra.mxu1 %v4705_v36  ;;  %v5354_v28 = vcombine.low %v508_v2, %v312_v22  ;;  %v75_v1 = vld [vmem:[%s6168_s0 + $0xa8] sm:$0xff]  ;;  %4314 = vmatpush3.bf16.msra.mxu0 %v4708_v4  ;;  %v530_v29 = vcombine.low %v312_v22, %v314_v26  ;;  %v142_v30 = vmul.f32 %v5155_v0, %v59_v25  ;;  %v4713_v36 = vld [vmem:[#allocation2 + $0x190] sm:$0xff]   ;;  %v4716_v63 = vld [vmem:[#allocation2 + $0x118] sm:$0xff]  }
  0x45   :  { %4341 = vmatprep.subr.bf16.mxu1 %v4707_v50  ;;  %4315 = vmatprep.subr.bf16.mxu0 %v4710_v11  ;;  %v710_v46 = vpack.c.bf16 %v3940_v52, %v3940_v52  ;;  %v158_v50 = vmul.f32 %v5155_v0, %v75_v1  ;;  %v144_v5 = vmul.f32 %v5259_v62, %v61_v32  ;;  %v66_v11 = vld [vmem:[%s6168_s0 + $0x60] sm:$0xf]  ;;  %v60_v26 = vld [vmem:[%s6168_s0 + $0x30] sm:$0xff]  ;;  %v4717_v1 = vld [vmem:[#allocation2 + $0x198] sm:$0xff]  }
  0x46   :  { %v711_v49 = vpack.c.bf16 %v5354_v28, %v5354_v28  ;;  %v3942_v2 = vcombine.high %v5230_v39, %v530_v29  ;;  %v5384_v3 = vadd.f32 %v5316_v60, %v142_v30  ;;  %v5387_v4 = vadd.f32 %v5316_v60, %v150_v31  ;;  %v74_v39 = vld [vmem:[%s6168_s0 + $0xa0] sm:$0xff] }
  0x47   :  { %v152_v54 = vmul.f32 %v5259_v62, %v69_v34  ;;  %v4718_v15 = vld [vmem:[#allocation2 + $0x160] sm:$0xff]   ;;  %2316 = vmatprep.mubr.bf16.mxu0 %v710_v46  ;;  %v5400_v45 = vadd.f32 %v5316_v60, %v158_v50  ;;  %v160_v22 = vmul.f32 %v5259_v62, %v77_v35  ;;  %v5404_v52 = vadd.f32 %v5325_v10, %v144_v5  ;;  %v76_v46 = vld [vmem:[%s6168_s0 + $0xb0] sm:$0xff] }
  0x48   :  { %4342 = vmatpush3.bf16.msra.mxu1 %v4709_v9  ;;  %4316 = vmatpush3.bf16.msra.mxu0 %v4712_v20  ;;  %v712_v28 = vpack.c.bf16 %v3942_v2, %v3942_v2  ;;  %v280_v25 = vrot.slane %v5384_v3, 7  ;;  %v293_v9 = vrot.slane %v5387_v4, 7  ;;  %v68_v20 = vld [vmem:[%s6168_s0 + $0x70] sm:$0xf]  ;;  %v4719_v32 = vld [vmem:[#allocation2 + $0x1e0] sm:$0xff]  }
  0x49   :  { %4343 = vmatprep.subr.bf16.mxu1 %v4711_v51  ;;  %v5412_v57 = vadd.f32 %v5325_v10, %v152_v54  ;;  %4317 = vmatprep.subr.bf16.mxu0 %v4714_v38  ;;  %v6181_v29 = vrot.slane %v5400_v45, 7  ;;  %v5416_v30 = vadd.f32 %v5325_v10, %v160_v22  ;;  %v282_v31 = vrot.slane %v5404_v52, 7  ;;  %v4721_v22 = vld [vmem:[#allocation2 + $0x1a0] sm:$0xff]  }
  0x4a   :  { %2317 = vmatmul.mubr.bf16.gmra.mrb[4].mxu0 %v709_v21  ;;  %v141_v51 = vmul.f32 %v5287_v58, %v58_v6  ;;  %2364 = vmatprep.mubr.bf16.mxu1 %v712_v28  ;;  %v294_v34 = vsel %vm274_vm0, %v280_v25, %v293_v9  ;;  %v149_v21 = vmul.f32 %v5287_v58, %v66_v11  ;;  %v4720_v6 = vld [vmem:[#allocation2 + $0x120] sm:$0xff]   ;;  %v4722_v28 = vld [vmem:[#allocation2 + $0x168] sm:$0xff]  }
  0x4b   :  { %v297_v35 = vrot.slane %v5412_v57, 7  ;;  %v157_v38 = vmul.f32 %v5287_v58, %v74_v39  ;;  %v5433_v50 = vsel %vm274_vm0, 0.0, %v6181_v29  ;;  %v6180_v5 = vrot.slane %v5416_v30, 7  ;;  %2365 = vmatmul.mubr.bf16.gmra.mrb[4].mxu1 %v711_v49 }
  0x4c   :  { %4344 = vmatpush3.bf16.msra.mxu1 %v4713_v36  ;;  %v5437_v2 = vadd.f32 %v5331_v61, %v141_v51  ;;  %v143_v54 = vmul.f32 %v5336_v24, %v60_v26  ;;  %4318 = vmatpush3.bf16.msra.mxu0 %v4716_v63  ;;  %v3920_v11 = vcombine.low %v294_v34, %v5433_v50  ;;  %v4723_v51 = vld [vmem:[#allocation2 + $0x1e8] sm:$0xff]  }
  0x4d   :  { %4345 = vmatprep.subr.bf16.mxu1 %v4715_v56  ;;  %v298_v39 = vsel %vm274_vm0, %v282_v31, %v297_v35  ;;  %v5443_v36 = vadd.f32 %v5331_v61, %v149_v21  ;;  %4319 = vmatprep.subr.bf16.mxu0 %v4718_v15  ;;  %v5448_v9 = vsel %vm274_vm0, 0.0, %v6180_v5  ;;  %v5451_v56 = vadd.f32 %v5331_v61, %v157_v38  ;;  %v4724_v21 = vld [vmem:[#allocation2 + $0x128] sm:$0xff]  }
  0x4e   :  { %v6182_v63 = vrot.slane %v5437_v2, 7  ;;  %v151_v26 = vmul.f32 %v5336_v24, %v68_v20  ;;  %v4174_v34 = vpack.c.bf16 %v3920_v11, %v280_v25  ;;  %v3922_v35 = vcombine.low %v298_v39, %v5448_v9  ;;  %v4726_v11 = vld [vmem:[#allocation2 + $0x170] sm:$0xff]  }
  0x4f   :  { %v291_v15 = vrot.slane %v5443_v36, 7  ;;  %v159_v49 = vmul.f32 %v5336_v24, %v76_v46  ;;  %v303_v5 = vrot.slane %v5451_v56, 7  ;;  %v5460_v29 = vadd.f32 %v5346_v55, %v143_v54  ;;  %v82_v46 = vld [vmem:[%s6168_s0 + $0xe0] sm:$0xf]  ;;  %v4725_v54 = vld [vmem:[#allocation2 + $0x1a8] sm:$0xff]   ;;  %v4727_v39 = vld [vmem:[#allocation2 + $0x1f0] sm:$0xff]  }
  0x50   :  { %4346 = vmatpush3.bf16.msra.mxu1 %v4717_v1  ;;  %v5463_v38 = vadd.f32 %v5346_v55, %v151_v26  ;;  %4320 = vmatpush3.bf16.msra.mxu0 %v4720_v6  ;;  %v4182_v20 = vpack.c.bf16 %v3922_v35, %v282_v31  ;;  %v83_v1 = vld [vmem:[%s6168_s0 + $0xe8] sm:$0xf]  ;;  %v165_v6 = vmul.f32 %v5287_v58, %v82_v46  ;;  %v84_v58 = vld [vmem:[%s6168_s0 + $0xf0] sm:$0xf] }
  0x51   :  { %4347 = vmatprep.subr.bf16.mxu1 %v4719_v32  ;;  %v5466_v25 = vadd.f32 %v5346_v55, %v159_v49  ;;  %4321 = vmatprep.subr.bf16.mxu0 %v4722_v28  ;;  %v351_v32 = vsel %vm274_vm0, 0.0, %v303_v5  ;;  %v292_v26 = vsel %vm274_vm0, %v6182_v63, %v291_v15  ;;  %v5500_v15 = vpack.c.bf16 %v3923_v23, %v5232_v40  ;;  %v4729_v46 = vld [vmem:[#allocation2 + $0x1b0] sm:$0xff]   ;;  %v4731_v23 = vld [vmem:[#allocation2 + $0x1f8] sm:$0xff]  }
  0x52   :  { %4175 = vmatprep.mubr.msk.bf16.mxu0 %vm5236_vm3, %v4174_v34  ;;  %4183 = vmatprep.mubr.msk.bf16.mxu1 %vm5236_vm3, %v4182_v20  ;;  %v295_v28 = vrot.slane %v5463_v38, 7  ;;  %v166_v34 = vmul.f32 %v5155_v0, %v83_v1  ;;  %v5488_v49 = vadd.f32 %v5331_v61, %v165_v6  ;;  %v85_v20 = vld [vmem:[%s6168_s0 + $0xf8] sm:$0xf]  ;;  %v4728_v0 = vld [vmem:[#allocation2 + $0x130] sm:$0xff]   ;;  %v3919_v6 = vcombine.low %v292_v26, %v351_v32 }
  0x53   :  { %v305_v35 = vrot.slane %v5466_v25, 7  ;;  %v4730_v1 = vld [vmem:[#allocation2 + $0x178] sm:$0xff]   ;;  %v510_v31 = vcombine.high %v351_v32, %v5433_v50  ;;  %v168_v33 = vmul.f32 %v5259_v62, %v85_v20  ;;  %v6196_v32 = vrot.slane %v5460_v29, 7 }
  0x54   :  { %4348 = vmatpush3.bf16.msra.mxu1 %v4721_v22  ;;  %4322 = vmatpush3.bf16.msra.mxu0 %v4724_v21  ;;  %v5503_v61 = vadd.f32 %v5316_v60, %v166_v34  ;;  %v167_v22 = vmul.f32 %v5336_v24, %v84_v58  ;;  %v315_v63 = vrot.slane %v5488_v49, 7  ;;  %v6195_v24 = vcombine.low %v5267_v7, %v5269_v8 }
  0x55   :  { %4349 = vmatprep.subr.bf16.mxu1 %v4723_v51  ;;  %4323 = vmatprep.subr.bf16.mxu0 %v4726_v11  ;;  %v353_v51 = vsel %vm274_vm0, 0.0, %v305_v35  ;;  %v296_v62 = vsel %vm274_vm0, %v6196_v32, %v295_v28  ;;  %v5525_v34 = vadd.f32 %v5325_v10, %v168_v33  ;;  %v6197_v58 = vrot.slane %v5400_v45, 7  ;;  %v4733_v33 = vld [vmem:[#allocation2 + $0x1b8] sm:$0xff]   ;;  %v4735_v32 = vld [vmem:[#allocation2 + $0x2c0] sm:$0xff]  }
  0x56   :  { %v317_v21 = vrot.slane %v5503_v61, 7  ;;  %v5512_v60 = vadd.f32 %v5346_v55, %v167_v22  ;;  %v5518_v11 = vpack.c.bf16 %v6195_v24, %v5265_v44  ;;  %v316_v26 = vsel %vm274_vm0, %v303_v5, %v315_v63  ;;  %v4734_v22 = vld [vmem:[#allocation2 + $0x240] sm:$0xff]  }
  0x57   :  { %v514_v55 = vcombine.high %v5243_v48, %v5184_v14  ;;  %v321_v5 = vrot.slane %v5525_v34, 7  ;;  %v6198_v63 = vrot.slane %v5437_v2, 7  ;;  %v512_v43 = vcombine.high %v353_v51, %v5448_v9 }
  0x58   :  { %4350 = vmatpush3.bf16.msra.mxu1 %v4725_v54  ;;  %4324 = vmatpush3.bf16.msra.mxu0 %v4728_v0  ;;  %v318_v20 = vsel %vm274_vm0, %v6197_v58, %v317_v21  ;;  %v319_v54 = vrot.slane %v5512_v60, 7  ;;  %v3921_v0 = vcombine.low %v296_v62, %v353_v51  ;;  %v516_v21 = vcombine.high %v5269_v8, %v5196_v19 }
  0x59   :  { %4351 = vmatprep.subr.bf16.mxu1 %v4727_v39  ;;  %4325 = vmatprep.subr.bf16.mxu0 %v4730_v1  ;;  %v531_v28 = vcombine.low %v316_v26, %v318_v20  ;;  %v5535_v10 = vcombine.low %v514_v55, %v5276_v16  ;;  %v4178_v39 = vpack.c.bf16 %v3919_v6, %v6198_v63  ;;  %v6199_v20 = vrot.slane %v5416_v30, 7  ;;  %v4736_v6 = vld [vmem:[#allocation2 + $0x200] sm:$0xff]  }
  0x5a   :  { %v320_v24 = vsel %vm274_vm0, %v305_v35, %v319_v54  ;;  %v5543_v58 = vcombine.low %v510_v31, %v316_v26  ;;  %v5550_v35 = vcombine.low %v516_v21, %v5303_v59  ;;  %v4738_v54 = vld [vmem:[#allocation2 + $0x248] sm:$0xff]   ;;  %v3924_v31 = vcombine.low %v5181_v13, %v5184_v14 }
  0x5b   :  { %v3944_v1 = vcombine.high %v5433_v50, %v531_v28  ;;  %v322_v55 = vsel %vm274_vm0, %v6199_v20, %v321_v5  ;;  %v3926_v26 = vcombine.low %v5193_v18, %v5196_v19  ;;  %v360_v51 = vrot.slane %v5181_v13, 1  ;;  %v4737_v28 = vld [vmem:[#allocation2 + $0x280] sm:$0xff]   ;;  %v4739_v21 = vld [vmem:[#allocation2 + $0x2c8] sm:$0xff]  }
  0x5c   :  { %4352 = vmatpush3.bf16.msra.mxu1 %v4729_v46  ;;  %4326 = vmatpush3.bf16.msra.mxu0 %v4732_v41  ;;  %v532_v62 = vcombine.low %v320_v24, %v322_v55  ;;  %v359_v46 = vrot.slane %v5178_v12, 1  ;;  %v6200_v41 = vrot.slane %v5460_v29, 7  ;;  %v3927_v63 = vcombine.low %v5443_v36, %v5451_v56 }
  0x5d   :  { %4353 = vmatprep.subr.bf16.mxu1 %v4731_v23  ;;  %4367 = vmatprep.subr.bf16.mxu0 %v4734_v22  ;;  %v714_v50 = vpack.c.bf16 %v3944_v1, %v3944_v1  ;;  %v383_v22 = vrot.slane %v5184_v14, 1  ;;  %v713_v1 = vpack.c.bf16 %v5543_v58, %v5543_v58  ;;  %v3945_v13 = vcombine.low %v512_v43, %v320_v24 }
  0x5e   :  { %v4186_v23 = vpack.c.bf16 %v3921_v0, %v6200_v41  ;;  %v3946_v5 = vcombine.high %v5448_v9, %v532_v62  ;;  %v3929_v0 = vcombine.low %v5463_v38, %v5466_v25  ;;  %v6185_v20 = vrot.slane %v5293_v27, 1  ;;  %v4740_v9 = vld [vmem:[#allocation2 + $0x208] sm:$0xff]  }
  0x5f   :  { %4179 = vmatmul.mubr.msk.bf16.vlgmr.msra.gmra.mrb[8].mxu0 %vm5236_vm3, %v4178_v39  ;;  %v5572_v62 = vpack.c.bf16 %v3927_v63, %v5437_v2  ;;  %v4742_v39 = vld [vmem:[#allocation2 + $0x250] sm:$0xff]   ;;  %v518_v24 = vcombine.high %v5451_v56, %v5400_v45  ;;  %v422_v58 = vsel %vm420_vm5, %v360_v51, 0.0 }
  0x60   :  { %4354 = vmatpush3.bf16.msra.mxu1 %v4733_v33  ;;  %4368 = vmatpush3.bf16.msra.mxu0 %v4736_v6  ;;  %v716_v55 = vpack.c.bf16 %v3946_v5, %v3946_v5  ;;  %v535_v33 = vcombine.low %v5488_v49, %v5503_v61  ;;  %v5577_v43 = vpack.c.bf16 %v3929_v0, %v5460_v29  ;;  %v4741_v6 = vld [vmem:[#allocation2 + $0x288] sm:$0xff]   ;;  %v4743_v63 = vld [vmem:[#allocation2 + $0x2d0] sm:$0xff]  }
  0x61   :  { %4395 = vmatprep.subr.bf16.mxu1 %v4735_v32  ;;  %4369 = vmatprep.subr.bf16.mxu0 %v4738_v54  ;;  %v536_v32 = vcombine.low %v5512_v60, %v5525_v34  ;;  %v520_v54 = vcombine.high %v5466_v25, %v5416_v30  ;;  %v5595_v5 = vsel %vm355_vm4, %v383_v22, %v6185_v20  ;;  %v4746_v22 = vld [vmem:[#allocation2 + $0x258] sm:$0xff]   ;;  %v4745_v20 = vld [vmem:[#allocation2 + $0x290] sm:$0xff]  }
  0x62   :  { %2412 = vmatprep.mubr.bf16.mxu0 %v714_v50  ;;  %v5587_v41 = vcombine.high %v5400_v45, %v535_v33  ;;  %v361_v50 = vsel %vm355_vm4, %v359_v46, %v360_v51  ;;  %v5598_v42 = vcombine.low %v518_v24, %v5488_v49  ;;  %v3932_v0 = vcombine.low %v422_v58, %v5595_v5  ;;  %v4744_v46 = vld [vmem:[#allocation2 + $0x210] sm:$0xff]  }
  0x63   :  { %4187 = vmatmul.mubr.msk.bf16.vlgmr.msra.gmra.mrb[8].mxu1 %vm5236_vm3, %v4186_v23  ;;  %v5601_v23 = vcombine.high %v5416_v30, %v536_v32  ;;  %v365_v33 = vrot.slane %v5190_v17, 1  ;;  %v5606_v51 = vcombine.low %v520_v54, %v5512_v60  ;;  %v389_v32 = vrot.slane %v5196_v19, 1 }
  0x64   :  { %4396 = vmatpush3.bf16.msra.mxu1 %v4737_v28  ;;  %2460 = vmatprep.mubr.bf16.mxu1 %v716_v55  ;;  %v366_v28 = vrot.slane %v5193_v18, 1  ;;  %v694_v55 = vpack.c.bf16 %v3924_v31, %v5178_v12  ;;  %v5610_v24 = vpack.c.bf16 %v3932_v0, %v361_v50  ;;  %v715_v58 = vpack.c.bf16 %v3945_v13, %v3945_v13  ;;  %v4748_v12 = vld [vmem:[#allocation2 + $0x218] sm:$0xff]   ;;  %v4751_v50 = vld [vmem:[#allocation2 + $0x2e0] sm:$0xff]  }
  0x65   :  { %4397 = vmatprep.subr.bf16.mxu1 %v4739_v21  ;;  %4370 = vmatpush3.bf16.msra.mxu0 %v4740_v9  ;;  %v390_v21 = vrot.slane %v5310_v53, 1  ;;  %v4747_v9 = vld [vmem:[#allocation2 + $0x2d8] sm:$0xff]   ;;  %v696_v54 = vpack.c.bf16 %v3926_v26, %v5190_v17  ;;  %v356_v13 = vrot.slane %v5232_v40, 1  ;;  %v380_v26 = vrot.slane %v5243_v48, 1 }
  0x66   :  { %4371 = vmatprep.subr.bf16.mxu0 %v4742_v39  ;;  %v367_v37 = vsel %vm355_vm4, %v365_v33, %v366_v28  ;;  %v424_v18 = vsel %vm420_vm5, %v366_v28, 0.0  ;;  %v4750_v39 = vld [vmem:[#allocation2 + $0x260] sm:$0xff]   ;;  %v4749_v17 = vld [vmem:[#allocation2 + $0x298] sm:$0xff]   ;;  %v381_v40 = vrot.slane %v5276_v16, 1  ;;  %v362_v48 = vrot.slane %v5265_v44, 1  ;;  %v4758_v44 = vld [vmem:[#allocation2 + $0x270] sm:$0xff]  }
  0x67   :  { %2413 = vmatmul.mubr.bf16.gmra.mrb[12].mxu0 %v713_v1  ;;  %v5620_v31 = vsel %vm355_vm4, %v389_v32, %v390_v21  ;;  %v4752_v33 = vld [vmem:[#allocation2 + $0x220] sm:$0xff]   ;;  %v4755_v32 = vld [vmem:[#allocation2 + $0x2e8] sm:$0xff]  }
  0x68   :  { %4398 = vmatpush3.bf16.msra.mxu1 %v4741_v6  ;;  %2500 = vmatprep.mubr.bf16.mxu0 %v694_v55  ;;  %v3934_v1 = vcombine.low %v424_v18, %v5620_v31  ;;  %v357_v6 = vrot.slane %v5241_v47, 1  ;;  %v4754_v47 = vld [vmem:[#allocation2 + $0x268] sm:$0xff]   ;;  %v382_v28 = vsel %vm355_vm4, %v380_v26, %v381_v40 }
  0x69   :  { %4399 = vmatprep.subr.bf16.mxu1 %v4743_v63  ;;  %4372 = vmatpush3.bf16.msra.mxu0 %v4744_v46  ;;  %v522_v55 = vcombine.high %v382_v28, %v5595_v5 }
  0x6a   :  { %4373 = vmatprep.subr.bf16.mxu0 %v4746_v22  ;;  %v5626_v63 = vpack.c.bf16 %v3934_v1, %v367_v37  ;;  %v358_v0 = vsel %vm355_vm4, %v356_v13, %v357_v6  ;;  %v421_v46 = vsel %vm420_vm5, %v357_v6, 0.0  ;;  %v363_v37 = vrot.slane %v5267_v7, 1  ;;  %v4757_v7 = vld [vmem:[#allocation2 + $0x2a8] sm:$0xff]  }
  0x6b   :  { %2461 = vmatmul.mubr.bf16.gmra.mrb[12].mxu1 %v715_v58  ;;  %v3931_v22 = vcombine.low %v421_v46, %v382_v28  ;;  %v386_v58 = vrot.slane %v5269_v8, 1  ;;  %v429_v1 = vsel %vm420_vm5, %v381_v40, 0.0  ;;  %v4759_v8 = vld [vmem:[#allocation2 + $0x2f0] sm:$0xff]   ;;  %v4762_v28 = vld [vmem:[#allocation2 + $0x278] sm:$0xff]   ;;  %v533_v40 = vcombine.low %v5276_v16, %v5293_v27 }
  0x6c   :  { %4400 = vmatpush3.bf16.msra.mxu1 %v4745_v20  ;;  %2548 = vmatprep.mubr.bf16.mxu1 %v696_v54  ;;  %v4753_v20 = vld [vmem:[#allocation2 + $0x2a0] sm:$0xff]   ;;  %v364_v18 = vsel %vm355_vm4, %v362_v48, %v363_v37  ;;  %v423_v13 = vsel %vm420_vm5, %v363_v37, 0.0  ;;  %v4761_v37 = vld [vmem:[#allocation2 + $0x2b0] sm:$0xff]   ;;  %v534_v16 = vcombine.low %v5303_v59, %v5310_v53 }
  0x6d   :  { %4401 = vmatprep.subr.bf16.mxu1 %v4747_v9  ;;  %4374 = vmatpush3.bf16.msra.mxu0 %v4748_v12  ;;  %v4756_v9 = vld [vmem:[#allocation2 + $0x228] sm:$0xff]   ;;  %v5636_v54 = vpack.c.bf16 %v3931_v22, %v358_v0  ;;  %v387_v12 = vrot.slane %v5303_v59, 1  ;;  %v4767_v53 = vld [vmem:[#allocation2 + $0x3c0] sm:$0xff]  }
  0x6e   :  { %4375 = vmatprep.subr.bf16.mxu0 %v4750_v39 }
  0x6f   :  { %v388_v39 = vsel %vm355_vm4, %v386_v58, %v387_v12  ;;  %v371_v58 = vrot.slane %v5384_v3, 1 }
  0x70   :  { %4402 = vmatpush3.bf16.msra.mxu1 %v4749_v17  ;;  %v3933_v6 = vcombine.low %v423_v13, %v388_v39  ;;  %v6201_v17 = vrot.slane %v5293_v27, 1  ;;  %v524_v0 = vcombine.high %v388_v39, %v5620_v31  ;;  %v372_v27 = vrot.slane %v5387_v4, 1  ;;  %v4765_v39 = vld [vmem:[#allocation2 + $0x2b8] sm:$0xff]  }
  0x71   :  { %4403 = vmatprep.subr.bf16.mxu1 %v4751_v50  ;;  %4376 = vmatpush3.bf16.msra.mxu0 %v4752_v33  ;;  %v5646_v50 = vcombine.low %v522_v55, %v429_v1  ;;  %v4760_v33 = vld [vmem:[#allocation2 + $0x230] sm:$0xff]  }
  0x72   :  { %4377 = vmatprep.subr.bf16.mxu0 %v4754_v47  ;;  %v430_v26 = vsel %vm420_vm5, %v6201_v17, 0.0  ;;  %v431_v47 = vsel %vm420_vm5, %v387_v12, 0.0  ;;  %v5652_v48 = vpack.c.bf16 %v3933_v6, %v364_v18  ;;  %v4764_v18 = vld [vmem:[#allocation2 + $0x238] sm:$0xff]   ;;  %v395_v12 = vrot.slane %v5400_v45, 1 }
  0x73   :  { %v537_v46 = vcombine.low %v429_v1, %v430_v26  ;;  %v5657_v22 = vcombine.low %v524_v0, %v431_v47  ;;  %v373_v13 = vsel %vm355_vm4, %v371_v58, %v372_v27  ;;  %v426_v59 = vsel %vm420_vm5, %v372_v27, 0.0  ;;  %v4770_v26 = vld [vmem:[#allocation2 + $0x348] sm:$0xff]  }
  0x74   :  { %4404 = vmatpush3.bf16.msra.mxu1 %v4753_v20  ;;  %v432_v20 = vsel %vm420_vm5, %v390_v21, 0.0  ;;  %v3950_v1 = vcombine.high %v5196_v19, %v534_v16  ;;  %v378_v17 = vrot.slane %v5412_v57, 1  ;;  %v4769_v19 = vld [vmem:[#allocation2 + $0x380] sm:$0xff]   ;;  %v4774_v16 = vld [vmem:[#allocation2 + $0x350] sm:$0xff]  }
  0x75   :  { %4405 = vmatprep.subr.bf16.mxu1 %v4755_v32  ;;  %4378 = vmatpush3.bf16.msra.mxu0 %v4756_v9  ;;  %v5660_v55 = vcombine.high %v5595_v5, %v537_v46  ;;  %v538_v32 = vcombine.low %v431_v47, %v432_v20  ;;  %v4763_v9 = vld [vmem:[#allocation2 + $0x2f8] sm:$0xff]   ;;  %v4766_v5 = vld [vmem:[#allocation2 + $0x340] sm:$0xff]  }
  0x76   :  { %4379 = vmatprep.subr.bf16.mxu0 %v4758_v44  ;;  %v3948_v44 = vcombine.high %v5184_v14, %v533_v40  ;;  %v4768_v14 = vld [vmem:[#allocation2 + $0x300] sm:$0xff]   ;;  %v4771_v40 = vld [vmem:[#allocation2 + $0x3c8] sm:$0xff]   ;;  %v720_v20 = vpack.c.bf16 %v3950_v1, %v3950_v1 }
  0x77   :  { %v5667_v21 = vcombine.high %v5620_v31, %v538_v32  ;;  %v4772_v32 = vld [vmem:[#allocation2 + $0x308] sm:$0xff]  }
  0x78   :  { %4406 = vmatpush3.bf16.msra.mxu1 %v4757_v7  ;;  %v396_v7 = vrot.slane %v5503_v61, 1  ;;  %v718_v0 = vpack.c.bf16 %v3948_v44, %v3948_v44  ;;  %v392_v44 = vrot.slane %v5451_v56, 1 }
  0x79   :  { %4407 = vmatprep.subr.bf16.mxu1 %v4759_v8  ;;  %4380 = vmatpush3.bf16.msra.mxu0 %v4760_v33  ;;  %v377_v8 = vrot.slane %v5404_v52, 1  ;;  %v401_v33 = vrot.slane %v5416_v30, 1 }
  0x7a   :  { %4381 = vmatprep.subr.bf16.mxu0 %v4762_v28  ;;  %v5678_v31 = vsel %vm355_vm4, %v395_v12, %v396_v7  ;;  %v402_v28 = vrot.slane %v5525_v34, 1  ;;  %v4773_v12 = vld [vmem:[#allocation2 + $0x388] sm:$0xff]  }
  0x7b   :  { %v3936_v6 = vcombine.low %v426_v59, %v5678_v31  ;;  %v379_v47 = vsel %vm355_vm4, %v377_v8, %v378_v17  ;;  %v4789_v34 = vld [vmem:[#allocation2 + $0x3a8] sm:$0xff]  }
  0x7c   :  { %4408 = vmatpush3.bf16.msra.mxu1 %v4761_v37  ;;  %v428_v37 = vsel %vm420_vm5, %v378_v17, 0.0  ;;  %v5693_v58 = vsel %vm355_vm4, %v401_v33, %v402_v28  ;;  %v4780_v17 = vld [vmem:[#allocation2 + $0x318] sm:$0xff]   ;;  %v436_v61 = vsel %vm420_vm5, %v402_v28, 0.0  ;;  %v4791_v28 = vld [vmem:[#allocation2 + $0x3f0] sm:$0xff]  }
  0x7d   :  { %4409 = vmatprep.subr.bf16.mxu1 %v4763_v9  ;;  %4382 = vmatpush3.bf16.msra.mxu0 %v4764_v18  ;;  %v5684_v46 = vpack.c.bf16 %v3936_v6, %v373_v13  ;;  %v368_v9 = vrot.slane %v5437_v2, 1  ;;  %v3938_v27 = vcombine.low %v428_v37, %v5693_v58  ;;  %v369_v18 = vrot.slane %v5443_v36, 1  ;;  %v4775_v2 = vld [vmem:[#allocation2 + $0x3d0] sm:$0xff]   ;;  %v4781_v33 = vld [vmem:[#allocation2 + $0x398] sm:$0xff]   ;;  %v4784_v37 = vld [vmem:[#allocation2 + $0x320] sm:$0xff]  }
  0x7e   :  { %4423 = vmatprep.subr.bf16.mxu0 %v4766_v5  ;;  %v717_v5 = vpack.c.bf16 %v5535_v10, %v5535_v10  ;;  %v3930_v13 = vcombine.low %v5412_v57, %v5416_v30  ;;  %v4776_v36 = vld [vmem:[#allocation2 + $0x310] sm:$0xff]   ;;  %v4778_v10 = vld [vmem:[#allocation2 + $0x358] sm:$0xff]   ;;  %v719_v30 = vpack.c.bf16 %v5550_v35, %v5550_v35  ;;  %v399_v35 = vrot.slane %v5512_v60, 1 }
  0x7f   :  { %v4777_v57 = vld [vmem:[#allocation2 + $0x390] sm:$0xff]  }
  0x80   :  { %4410 = vmatpush3.bf16.msra.mxu1 %v4765_v39  ;;  %2501 = vmatmul.mubr.bf16.vlgmr.msra.gmra.mrb[16].mxu0 %v5500_v15  ;;  %v3928_v15 = vcombine.low %v5387_v4, %v5400_v45  ;;  %v5706_v39 = vpack.c.bf16 %v3938_v27, %v379_v47  ;;  %v370_v4 = vsel %vm355_vm4, %v368_v9, %v369_v18  ;;  %v393_v45 = vrot.slane %v5488_v49, 1 }
  0x81   :  { %4451 = vmatprep.subr.bf16.mxu1 %v4767_v53  ;;  %4424 = vmatpush3.bf16.msra.mxu0 %v4768_v14  ;;  %v374_v53 = vrot.slane %v5460_v29, 1  ;;  %v375_v49 = vrot.slane %v5463_v38, 1  ;;  %v4779_v14 = vld [vmem:[#allocation2 + $0x3d8] sm:$0xff]   ;;  %v700_v6 = vpack.c.bf16 %v3930_v13, %v5404_v52  ;;  %v4782_v38 = vld [vmem:[#allocation2 + $0x360] sm:$0xff]   ;;  %v435_v9 = vsel %vm420_vm5, %v399_v35, 0.0  ;;  %v4790_v13 = vld [vmem:[#allocation2 + $0x370] sm:$0xff]  }
  0x82   :  { %4425 = vmatprep.subr.bf16.mxu0 %v4770_v26  ;;  %2508 = vmatprep.mubr.bf16.mxu0 %v718_v0  ;;  %v698_v56 = vpack.c.bf16 %v3928_v15, %v5384_v3  ;;  %v394_v59 = vsel %vm355_vm4, %v392_v44, %v393_v45  ;;  %v398_v3 = vrot.slane %v5466_v25, 1  ;;  %v433_v25 = vsel %vm420_vm5, %v393_v45, 0.0  ;;  %v4788_v44 = vld [vmem:[#allocation2 + $0x328] sm:$0xff]   ;;  %v4793_v45 = vld [vmem:[#allocation2 + $0x3b0] sm:$0xff]  }
  0x83   :  { %2549 = vmatmul.mubr.bf16.vlgmr.msra.gmra.mrb[16].mxu1 %v5518_v11  ;;  %v425_v11 = vsel %vm420_vm5, %v369_v18, 0.0  ;;  %v526_v8 = vcombine.high %v394_v59, %v5678_v31  ;;  %v376_v26 = vsel %vm355_vm4, %v374_v53, %v375_v49  ;;  %v427_v0 = vsel %vm420_vm5, %v375_v49, 0.0  ;;  %v4802_v53 = vld [vmem:[#allocation2 + $0x448] sm:$0xff]  }
  0x84   :  { %4452 = vmatpush3.bf16.msra.mxu1 %v4769_v19  ;;  %2556 = vmatprep.mubr.bf16.mxu1 %v720_v20  ;;  %v3935_v1 = vcombine.low %v425_v11, %v394_v59  ;;  %v400_v52 = vsel %vm355_vm4, %v398_v3, %v399_v35  ;;  %v4783_v19 = vld [vmem:[#allocation2 + $0x3e0] sm:$0xff]   ;;  %v4796_v11 = vld [vmem:[#allocation2 + $0x338] sm:$0xff]   ;;  %v724_v49 = vpack.c.bf16 %v5601_v23, %v5601_v23  ;;  %v4807_v3 = vld [vmem:[#allocation2 + $0x4d0] sm:$0xff]  }
  0x85   :  { %4453 = vmatprep.subr.bf16.mxu1 %v4771_v40  ;;  %4426 = vmatpush3.bf16.msra.mxu0 %v4772_v32  ;;  %v3937_v47 = vcombine.low %v427_v0, %v400_v52  ;;  %v434_v40 = vsel %vm420_vm5, %v396_v7, 0.0  ;;  %v5730_v60 = vcombine.low %v526_v8, %v433_v25  ;;  %v528_v20 = vcombine.high %v400_v52, %v5693_v58  ;;  %v4785_v7 = vld [vmem:[#allocation2 + $0x3a0] sm:$0xff]   ;;  %v4804_v8 = vld [vmem:[#allocation2 + $0x408] sm:$0xff]   ;;  %v4810_v23 = vld [vmem:[#allocation2 + $0x458] sm:$0xff]  }
  0x86   :  { %4427 = vmatprep.subr.bf16.mxu0 %v4774_v16  ;;  %v5720_v29 = vpack.c.bf16 %v3935_v1, %v370_v4  ;;  %v539_v32 = vcombine.low %v433_v25, %v434_v40  ;;  %v4786_v16 = vld [vmem:[#allocation2 + $0x368] sm:$0xff]   ;;  %v4792_v4 = vld [vmem:[#allocation2 + $0x330] sm:$0xff]   ;;  %v4800_v59 = vld [vmem:[#allocation2 + $0x400] sm:$0xff]  }
  0x87   :  { %v5734_v15 = vpack.c.bf16 %v3937_v47, %v376_v26  ;;  %v5739_v27 = vcombine.low %v528_v20, %v435_v9  ;;  %v4803_v1 = vld [vmem:[#allocation2 + $0x4c8] sm:$0xff]   ;;  %v723_v26 = vpack.c.bf16 %v5606_v51, %v5606_v51  ;;  %v4811_v35 = vld [vmem:[#allocation2 + $0x4d8] sm:$0xff]   ;;  %v4815_v0 = vld [vmem:[#allocation2 + $0x4e0] sm:$0xff]  }
  0x88   :  { %4454 = vmatpush3.bf16.msra.mxu1 %v4773_v12  ;;  %2509 = vmatmul.mubr.bf16.gmra.mrb[20].mxu0 %v717_v5  ;;  %v5742_v18 = vcombine.high %v5678_v31, %v539_v32  ;;  %v540_v12 = vcombine.low %v435_v9, %v436_v61  ;;  %v4787_v5 = vld [vmem:[#allocation2 + $0x3e8] sm:$0xff]   ;;  %v4794_v31 = vld [vmem:[#allocation2 + $0x378] sm:$0xff]   ;;  %v4817_v52 = vld [vmem:[#allocation2 + $0x4a0] sm:$0xff]  }
  0x89   :  { %4455 = vmatprep.subr.bf16.mxu1 %v4775_v2  ;;  %4428 = vmatpush3.bf16.msra.mxu0 %v4776_v36  ;;  %v4795_v36 = vld [vmem:[#allocation2 + $0x3f8] sm:$0xff]   ;;  %v4818_v51 = vld [vmem:[#allocation2 + $0x468] sm:$0xff]   ;;  %v4822_v47 = vld [vmem:[#allocation2 + $0x470] sm:$0xff]  }
  0x8a   :  { %4429 = vmatprep.subr.bf16.mxu0 %v4778_v10  ;;  %2596 = vmatprep.mubr.bf16.mxu0 %v698_v56  ;;  %v5745_v2 = vcombine.high %v5693_v58, %v540_v12  ;;  %v4798_v10 = vld [vmem:[#allocation2 + $0x440] sm:$0xff]   ;;  %v4797_v58 = vld [vmem:[#allocation2 + $0x3b8] sm:$0xff]   ;;  %v4819_v25 = vld [vmem:[#allocation2 + $0x4e8] sm:$0xff]  }
  0x8b   :  { %2557 = vmatmul.mubr.bf16.gmra.mrb[20].mxu1 %v719_v30  ;;  %v4799_v56 = vld [vmem:[#allocation2 + $0x4c0] sm:$0xff]   ;;  %v4823_v40 = vld [vmem:[#allocation2 + $0x4f0] sm:$0xff]   ;;  %v4827_v32 = vld [vmem:[#allocation2 + $0x4f8] sm:$0xff]  }
  0x8c   :  { %4456 = vmatpush3.bf16.msra.mxu1 %v4777_v57  ;;  %2644 = vmatprep.mubr.bf16.mxu1 %v700_v6  ;;  %v722_v57 = vpack.c.bf16 %v5587_v41, %v5587_v41  ;;  %v4801_v30 = vld [vmem:[#allocation2 + $0x480] sm:$0xff]   ;;  %v4805_v6 = vld [vmem:[#allocation2 + $0x488] sm:$0xff]   ;;  %v721_v41 = vpack.c.bf16 %v5598_v42, %v5598_v42  ;;  %v4813_v42 = vld [vmem:[#allocation2 + $0x498] sm:$0xff]  }
  0x8d   :  { %4457 = vmatprep.subr.bf16.mxu1 %v4779_v14  ;;  %4430 = vmatpush3.bf16.msra.mxu0 %v4780_v17  ;;  %v4806_v14 = vld [vmem:[#allocation2 + $0x450] sm:$0xff]   ;;  %v4828_v9 = vld [vmem:[#allocation2 + $0x438] sm:$0xff]   ;;  %v4832_v12 = vld [vmem:[#allocation2 + $0x500] sm:$0xff]  }
  0x8e   :  { %4431 = vmatprep.subr.bf16.mxu0 %v4782_v38  ;;  %v4809_v17 = vld [vmem:[#allocation2 + $0x490] sm:$0xff]   ;;  %v4814_v38 = vld [vmem:[#allocation2 + $0x460] sm:$0xff]   ;;  %v4829_v61 = vld [vmem:[#allocation2 + $0x4b8] sm:$0xff]  }
  0x8f   :  { %v4824_v20 = vld [vmem:[#allocation2 + $0x430] sm:$0xff]  }
  0x90   :  { %4458 = vmatpush3.bf16.msra.mxu1 %v4781_v33  ;;  %v4816_v33 = vld [vmem:[#allocation2 + $0x420] sm:$0xff]  }
  0x91   :  { %4459 = vmatprep.subr.bf16.mxu1 %v4783_v19  ;;  %4432 = vmatpush3.bf16.msra.mxu0 %v4784_v37  ;;  %v4820_v19 = vld [vmem:[#allocation2 + $0x428] sm:$0xff]   ;;  %v4825_v37 = vld [vmem:[#allocation2 + $0x4b0] sm:$0xff]  }
  0x92   :  { %4433 = vmatprep.subr.bf16.mxu0 %v4786_v16  ;;  %v4830_v16 = vld [vmem:[#allocation2 + $0x540] sm:$0xff]  }
  0x94   :  { %4460 = vmatpush3.bf16.msra.mxu1 %v4785_v7  ;;  %v4831_v7 = vld [vmem:[#allocation2 + $0x5c0] sm:$0xff]  }
  0x95   :  { %4461 = vmatprep.subr.bf16.mxu1 %v4787_v5  ;;  %4434 = vmatpush3.bf16.msra.mxu0 %v4788_v44  ;;  %v4834_v5 = vld [vmem:[#allocation2 + $0x548] sm:$0xff]   ;;  %v726_v44 = vpack.c.bf16 %v5660_v55, %v5660_v55  ;;  %v725_v55 = vpack.c.bf16 %v5646_v50, %v5646_v50  ;;  %v4846_v50 = vld [vmem:[#allocation2 + $0x560] sm:$0xff]  }
  0x96   :  { %4435 = vmatprep.subr.bf16.mxu0 %v4790_v13  ;;  %v4833_v13 = vld [vmem:[#allocation2 + $0x580] sm:$0xff]  }
  0x98   :  { %4462 = vmatpush3.bf16.msra.mxu1 %v4789_v34  ;;  %v4835_v34 = vld [vmem:[#allocation2 + $0x5c8] sm:$0xff]  }
  0x99   :  { %4463 = vmatprep.subr.bf16.mxu1 %v4791_v28  ;;  %4436 = vmatpush3.bf16.msra.mxu0 %v4792_v4  ;;  %v728_v28 = vpack.c.bf16 %v5667_v21, %v5667_v21  ;;  %v4836_v4 = vld [vmem:[#allocation2 + $0x508] sm:$0xff]   ;;  %v4842_v21 = vld [vmem:[#allocation2 + $0x558] sm:$0xff]  }
  0x9a   :  { %4437 = vmatprep.subr.bf16.mxu0 %v4794_v31  ;;  %v4838_v31 = vld [vmem:[#allocation2 + $0x550] sm:$0xff]  }
  0x9c   :  { %4464 = vmatpush3.bf16.msra.mxu1 %v4793_v45  ;;  %v4837_v45 = vld [vmem:[#allocation2 + $0x588] sm:$0xff]  }
  0x9d   :  { %4465 = vmatprep.subr.bf16.mxu1 %v4795_v36  ;;  %4438 = vmatpush3.bf16.msra.mxu0 %v4796_v11  ;;  %v4839_v36 = vld [vmem:[#allocation2 + $0x5d0] sm:$0xff]  }
  0x9e   :  { %4479 = vmatprep.subr.bf16.mxu0 %v4798_v10  ;;  %v4841_v11 = vld [vmem:[#allocation2 + $0x590] sm:$0xff]   ;;  %v727_v10 = vpack.c.bf16 %v5657_v22, %v5657_v22  ;;  %v4849_v22 = vld [vmem:[#allocation2 + $0x5a0] sm:$0xff]  }
  0xa0   :  { %4466 = vmatpush3.bf16.msra.mxu1 %v4797_v58  ;;  %2597 = vmatmul.mubr.bf16.vlgmr.msra.gmra.mrb[24].mxu0 %v5572_v62  ;;  %v4808_v62 = vld [vmem:[#allocation2 + $0x410] sm:$0xff]   ;;  %v4843_v58 = vld [vmem:[#allocation2 + $0x5d8] sm:$0xff]  }
  0xa1   :  { %4507 = vmatprep.subr.bf16.mxu1 %v4799_v56  ;;  %4480 = vmatpush3.bf16.msra.mxu0 %v4800_v59  ;;  %v4845_v56 = vld [vmem:[#allocation2 + $0x598] sm:$0xff]   ;;  %v4847_v59 = vld [vmem:[#allocation2 + $0x5e0] sm:$0xff]  }
  0xa2   :  { %4481 = vmatprep.subr.bf16.mxu0 %v4802_v53  ;;  %2604 = vmatprep.mubr.bf16.mxu0 %v722_v57  ;;  %v4848_v53 = vld [vmem:[#allocation2 + $0x520] sm:$0xff]   ;;  %v4850_v57 = vld [vmem:[#allocation2 + $0x568] sm:$0xff]  }
  0xa3   :  { %2645 = vmatmul.mubr.bf16.vlgmr.msra.gmra.mrb[24].mxu1 %v5577_v43  ;;  %v4812_v43 = vld [vmem:[#allocation2 + $0x418] sm:$0xff]  }
  0xa4   :  { %4508 = vmatpush3.bf16.msra.mxu1 %v4801_v30  ;;  %2652 = vmatprep.mubr.bf16.mxu1 %v724_v49  ;;  %v4851_v30 = vld [vmem:[#allocation2 + $0x5e8] sm:$0xff]   ;;  %v4854_v49 = vld [vmem:[#allocation2 + $0x570] sm:$0xff]  }
  0xa5   :  { %4509 = vmatprep.subr.bf16.mxu1 %v4803_v1  ;;  %4482 = vmatpush3.bf16.msra.mxu0 %v4804_v8  ;;  %v4852_v1 = vld [vmem:[#allocation2 + $0x528] sm:$0xff]  }
  0xa6   :  { %4483 = vmatprep.subr.bf16.mxu0 %v4806_v14  ;;  %v4853_v8 = vld [vmem:[#allocation2 + $0x5a8] sm:$0xff]   ;;  %v4856_v14 = vld [vmem:[#allocation2 + $0x530] sm:$0xff]  }
  0xa8   :  { %4510 = vmatpush3.bf16.msra.mxu1 %v4805_v6  ;;  %2605 = vmatmul.mubr.bf16.gmra.mrb[28].mxu0 %v721_v41  ;;  %v4858_v6 = vld [vmem:[#allocation2 + $0x578] sm:$0xff]  }
  0xa9   :  { %4511 = vmatprep.subr.bf16.mxu1 %v4807_v3  ;;  %4484 = vmatpush3.bf16.msra.mxu0 %v4808_v62  ;;  %v4859_v41 = vld [vmem:[#allocation2 + $0x5f8] sm:$0xff]  }
  0xaa   :  { %4485 = vmatprep.subr.bf16.mxu0 %v4810_v23  ;;  %2692 = vmatprep.mubr.bf16.mxu0 %v5610_v24  ;;  %v4821_v24 = vld [vmem:[#allocation2 + $0x4a8] sm:$0xff]   ;;  %v4860_v3 = vld [vmem:[#allocation2 + $0x538] sm:$0xff]   ;;  %v730_v23 = vpack.c.bf16 %v5742_v18, %v5742_v18 }
  0xab   :  { %2653 = vmatmul.mubr.bf16.gmra.mrb[28].mxu1 %v723_v26  ;;  %v4861_v62 = vld [vmem:[#allocation2 + $0x5b8] sm:$0xff]   ;;  %v729_v26 = vpack.c.bf16 %v5730_v60, %v5730_v60 }
  0xac   :  { %4512 = vmatpush3.bf16.msra.mxu1 %v4809_v17  ;;  %2740 = vmatprep.mubr.bf16.mxu1 %v5626_v63  ;;  %v4826_v63 = vld [vmem:[#allocation2 + $0x478] sm:$0xff]   ;;  %v732_v17 = vpack.c.bf16 %v5745_v2, %v5745_v2 }
  0xad   :  { %4513 = vmatprep.subr.bf16.mxu1 %v4811_v35  ;;  %4486 = vmatpush3.bf16.msra.mxu0 %v4812_v43  ;;  %v731_v35 = vpack.c.bf16 %v5739_v27, %v5739_v27 }
  0xae   :  { %4487 = vmatprep.subr.bf16.mxu0 %v4814_v38 }
  0xb0   :  { %4514 = vmatpush3.bf16.msra.mxu1 %v4813_v42 }
  0xb1   :  { %4515 = vmatprep.subr.bf16.mxu1 %v4815_v0  ;;  %4488 = vmatpush3.bf16.msra.mxu0 %v4816_v33 }
  0xb2   :  { %4489 = vmatprep.subr.bf16.mxu0 %v4818_v51 }
  0xb4   :  { %4516 = vmatpush3.bf16.msra.mxu1 %v4817_v52 }
  0xb5   :  { %4517 = vmatprep.subr.bf16.mxu1 %v4819_v25  ;;  %4490 = vmatpush3.bf16.msra.mxu0 %v4820_v19 }
  0xb6   :  { %4491 = vmatprep.subr.bf16.mxu0 %v4822_v47 }
  0xb8   :  { %4518 = vmatpush3.bf16.msra.mxu1 %v4821_v24 }
  0xb9   :  { %4519 = vmatprep.subr.bf16.mxu1 %v4823_v40  ;;  %4492 = vmatpush3.bf16.msra.mxu0 %v4824_v20 }
  0xba   :  { %4493 = vmatprep.subr.bf16.mxu0 %v4826_v63 }
  0xbc   :  { %4520 = vmatpush3.bf16.msra.mxu1 %v4825_v37 }
  0xbd   :  { %4521 = vmatprep.subr.bf16.mxu1 %v4827_v32  ;;  %4494 = vmatpush3.bf16.msra.mxu0 %v4828_v9 }
  0xbe   :  { %4535 = vmatprep.subr.bf16.mxu0 %v4830_v16 }
  0xc0   :  { %4522 = vmatpush3.bf16.msra.mxu1 %v4829_v61  ;;  %2693 = vmatmul.mubr.bf16.vlgmr.msra.gmra.mrb[32].mxu0 %v5636_v54  ;;  %v4840_v54 = vld [vmem:[#allocation2 + $0x510] sm:$0xff]  }
  0xc1   :  { %4563 = vmatprep.subr.bf16.mxu1 %v4831_v7  ;;  %4536 = vmatpush3.bf16.msra.mxu0 %v4832_v12  ;;  %v4862_v7 = vld [vmem:[%s6175_s7] ss:$8 sps:$4 sm:$0xff]   ;;  %v4864_v12 = vld [vmem:[%s6175_s7 + $0x4] ss:$8 sps:$4 sm:$0xff]  }
  0xc2   :  { %4537 = vmatprep.subr.bf16.mxu0 %v4834_v5  ;;  %2700 = vmatprep.mubr.bf16.mxu0 %v726_v44 }
  0xc3   :  { %2741 = vmatmul.mubr.bf16.vlgmr.msra.gmra.mrb[32].mxu1 %v5652_v48  ;;  %v4844_v48 = vld [vmem:[#allocation2 + $0x518] sm:$0xff]  }
  0xc4   :  { %4564 = vmatpush3.bf16.msra.mxu1 %v4833_v13  ;;  %2748 = vmatprep.mubr.bf16.mxu1 %v728_v28  ;;  %v4865_v13 = vld [vmem:[%s6175_s7 + $0x100] ss:$8 sps:$4 sm:$0xff]  }
  0xc5   :  { %4565 = vmatprep.subr.bf16.mxu1 %v4835_v34  ;;  %4538 = vmatpush3.bf16.msra.mxu0 %v4836_v4  ;;  %v4867_v34 = vld [vmem:[%s6175_s7 + $0x104] ss:$8 sps:$4 sm:$0xff]   ;;  %v4870_v4 = vld [vmem:[%s6175_s7 + $0x14] ss:$8 sps:$4 sm:$0xff]  }
  0xc6   :  { %4539 = vmatprep.subr.bf16.mxu0 %v4838_v31 }
  0xc8   :  { %4566 = vmatpush3.bf16.msra.mxu1 %v4837_v45  ;;  %2701 = vmatmul.mubr.bf16.gmra.mrb[36].mxu0 %v725_v55  ;;  %v4868_v45 = vld [vmem:[%s6175_s7 + $0x10] ss:$8 sps:$4 sm:$0xff]   ;;  %v4873_v55 = vld [vmem:[%s6175_s7 + $0x114] ss:$8 sps:$4 sm:$0xff]  }
  0xc9   :  { %4567 = vmatprep.subr.bf16.mxu1 %v4839_v36  ;;  %4540 = vmatpush3.bf16.msra.mxu0 %v4840_v54  ;;  %v4871_v36 = vld [vmem:[%s6175_s7 + $0x110] ss:$8 sps:$4 sm:$0xff]  }
  0xca   :  { %4541 = vmatprep.subr.bf16.mxu0 %v4842_v21  ;;  %2788 = vmatprep.mubr.bf16.mxu0 %v5684_v46  ;;  %v4855_v46 = vld [vmem:[#allocation2 + $0x5f0] sm:$0xff]  }
  0xcb   :  { %2749 = vmatmul.mubr.bf16.gmra.mrb[36].mxu1 %v727_v10 }
  0xcc   :  { %4568 = vmatpush3.bf16.msra.mxu1 %v4841_v11  ;;  %2836 = vmatprep.mubr.bf16.mxu1 %v5706_v39  ;;  %v4857_v39 = vld [vmem:[#allocation2 + $0x5b0] sm:$0xff]  }
  0xcd   :  { %4569 = vmatprep.subr.bf16.mxu1 %v4843_v58  ;;  %4542 = vmatpush3.bf16.msra.mxu0 %v4844_v48  ;;  %v4876_v58 = vld [vmem:[%s6175_s7 + $0x24] ss:$8 sps:$4 sm:$0xff]  }
  0xce   :  { %4543 = vmatprep.subr.bf16.mxu0 %v4846_v50  ;;  %v4874_v50 = vld [vmem:[%s6175_s7 + $0x20] ss:$8 sps:$4 sm:$0xff]  }
  0xd0   :  { %4570 = vmatpush3.bf16.msra.mxu1 %v4845_v56 }
  0xd1   :  { %4571 = vmatprep.subr.bf16.mxu1 %v4847_v59  ;;  %4544 = vmatpush3.bf16.msra.mxu0 %v4848_v53 }
  0xd2   :  { %4545 = vmatprep.subr.bf16.mxu0 %v4850_v57 }
  0xd4   :  { %4572 = vmatpush3.bf16.msra.mxu1 %v4849_v22 }
  0xd5   :  { %4573 = vmatprep.subr.bf16.mxu1 %v4851_v30  ;;  %4546 = vmatpush3.bf16.msra.mxu0 %v4852_v1  ;;  %v4879_v1 = vld [vmem:[%s6175_s7 + $0x124] ss:$8 sps:$4 sm:$0xff]  }
  0xd6   :  { %4547 = vmatprep.subr.bf16.mxu0 %v4854_v49 }
  0xd8   :  { %4574 = vmatpush3.bf16.msra.mxu1 %v4853_v8 }
  0xd9   :  { %4575 = vmatprep.subr.bf16.mxu1 %v4855_v46  ;;  %4548 = vmatpush3.bf16.msra.mxu0 %v4856_v14  ;;  %v4877_v46 = vld [vmem:[%s6175_s7 + $0x120] ss:$8 sps:$4 sm:$0xff]  }
  0xda   :  { %4549 = vmatprep.subr.bf16.mxu0 %v4858_v6 }
  0xdc   :  { %4576 = vmatpush3.bf16.msra.mxu1 %v4857_v39  ;;  %v4882_v39 = vld [vmem:[%s6175_s7 + $0x34] ss:$8 sps:$4 sm:$0xff]  }
  0xdd   :  { %4577 = vmatprep.subr.bf16.mxu1 %v4859_v41  ;;  %4550 = vmatpush3.bf16.msra.mxu0 %v4860_v3  ;;  %v4880_v3 = vld [vmem:[%s6175_s7 + $0x30] ss:$8 sps:$4 sm:$0xff]  }
  0xde   :  { %3746 = vmatprep.subr.bf16.mxu0 %v4867_v34 }
  0xe0   :  { %4578 = vmatpush3.bf16.msra.mxu1 %v4861_v62  ;;  %2789 = vmatmul.mubr.bf16.vlgmr.msra.gmra.mrb[40].mxu0 %v5720_v29  ;;  %v3963_v29 = vld [vmem:[%s6174_s6] ss:$0 sm:$0xff] }
  0xe1   :  { %2796 = vmatprep.mubr.bf16.mxu0 %v730_v23  ;;  %3705 = vmatprep.subr.bf16.mxu1 %v4864_v12  ;;  %v4907_v12 = vld [vmem:[%s6175_s7 + $0x170] ss:$8 sps:$4 sm:$0xff]  }
  0xe2   :  { %3747 = vmatpush1.bf16.msra.mxu0 %v4865_v13  ;;  %v4912_v13 = vld [vmem:[%s6175_s7 + $0x84] ss:$8 sps:$4 sm:$0xff]  }
  0xe3   :  { %2837 = vmatmul.mubr.bf16.vlgmr.msra.gmra.mrb[40].mxu1 %v5734_v15  ;;  %3748 = vmatprep.subr.bf16.mxu0 %v4873_v55 }
  0xe4   :  { %2844 = vmatprep.mubr.bf16.mxu1 %v732_v17  ;;  %3706 = vmatpush1.bf16.msra.mxu1 %v4862_v7  ;;  %v4885_v17 = vld [vmem:[%s6175_s7 + $0x134] ss:$8 sps:$4 sm:$0xff]  }
  0xe5   :  { %3707 = vmatprep.subr.bf16.mxu1 %v4870_v4  ;;  %v4910_v4 = vld [vmem:[%s6175_s7 + $0x80] ss:$8 sps:$4 sm:$0xff]  }
  0xe6   :  { %3749 = vmatpush1.bf16.msra.mxu0 %v4871_v36  ;;  %v4915_v36 = vld [vmem:[%s6175_s7 + $0x184] ss:$8 sps:$4 sm:$0xff]  }
  0xe7   :  { %3750 = vmatprep.subr.bf16.mxu0 %v4879_v1  ;;  %v4919_v1 = vld [vmem:[%s6175_s7 + $0x190] ss:$8 sps:$4 sm:$0xff]  }
  0xe8   :  { %2797 = vmatmul.mubr.bf16.gmra.mrb[44].mxu0 %v729_v26  ;;  %3708 = vmatpush1.bf16.msra.mxu1 %v4868_v45 }
  0xe9   :  { %3709 = vmatprep.subr.bf16.mxu1 %v4876_v58 }
  0xea   :  { %3751 = vmatpush1.bf16.msra.mxu0 %v4877_v46  ;;  %v4924_v46 = vld [vmem:[%s6175_s7 + $0xa4] ss:$8 sps:$4 sm:$0xff]  }
  0xeb   :  { %2845 = vmatmul.mubr.bf16.gmra.mrb[44].mxu1 %v731_v35  ;;  %3752 = vmatprep.subr.bf16.mxu0 %v4885_v17 }
  0xec   :  { %3710 = vmatpush1.bf16.msra.mxu1 %v4874_v50 }
  0xed   :  { %3711 = vmatprep.subr.bf16.mxu1 %v4882_v39  ;;  %v4922_v39 = vld [vmem:[%s6175_s7 + $0xa0] ss:$8 sps:$4 sm:$0xff]  }
  0xf0   :  { %3712 = vmatpush1.bf16.msra.mxu1 %v4880_v3 }
 0x112   :  { %v4271_v43 = vpop.f32.mrb[0].mxu0 }
 0x113   :  { %v4272_v18 = vpop.f32.mrb[1].mxu0 }
 0x114   :  { %v4273_v38 = vadd.f32 %v4272_v18, %v4271_v43  ;;  %v4274_v2 = vpop.f32.mrb[2].mxu0  ;;  %v4883_v43 = vld [vmem:[%s6175_s7 + $0x130] ss:$8 sps:$4 sm:$0xff]  }
 0x115   :  { %v4275_v0 = vpop.f32.mrb[3].mxu0  ;;  %3753 = vmatpush1.bf16.msra.mxu0 %v4883_v43  ;;  %v4930_v43 = vld [vmem:[%s6175_s7 + $0xb4] ss:$8 sps:$4 sm:$0xff]  }
 0x116   :  { %v4299_v42 = vpop.f32.mrb[0].mxu1  ;;  %v2311_v15 = vadd.f32 %v4273_v38, %v3963_v29  ;;  %v4276_v51 = vadd.f32 %v4275_v0, %v4274_v2 }
 0x117   :  { %v4300_v33 = vpop.f32.mrb[1].mxu1 }
 0x118   :  { %v4301_v52 = vadd.f32 %v4300_v33, %v4299_v42  ;;  %v4302_v60 = vpop.f32.mrb[2].mxu1  ;;  %v2314_v25 = vadd.f32 %v4276_v51, %v3963_v29  ;;  %v4888_v51 = vld [vmem:[%s6175_s7 + $0x44] ss:$8 sps:$4 sm:$0xff]  }
 0x119   :  { %v4303_v19 = vpop.f32.mrb[3].mxu1  ;;  %3713 = vmatprep.subr.bf16.mxu1 %v4888_v51  ;;  %v4937_v51 = vld [vmem:[%s6175_s7 + $0x1c0] ss:$8 sps:$4 sm:$0xff]  }
 0x11a   :  { %v2359_v27 = vadd.f32 %v4301_v52, %v2311_v15  ;;  %v4304_v47 = vadd.f32 %v4303_v19, %v4302_v60  ;;  %v4886_v52 = vld [vmem:[%s6175_s7 + $0x40] ss:$8 sps:$4 sm:$0xff]   ;;  %v4891_v60 = vld [vmem:[%s6175_s7 + $0x144] ss:$8 sps:$4 sm:$0xff]   ;;  %v4894_v19 = vld [vmem:[%s6175_s7 + $0x54] ss:$8 sps:$4 sm:$0xff]  }
 0x11b   :  { %3714 = vmatpush1.bf16.msra.mxu1 %v4886_v52  ;;  %3754 = vmatprep.subr.bf16.mxu0 %v4891_v60  ;;  %v4945_v52 = vld [vmem:[%s6175_s7 + $0x1d4] ss:$8 sps:$4 sm:$0xff]   ;;  %v4940_v60 = vld [vmem:[%s6175_s7 + $0xd0] ss:$8 sps:$4 sm:$0xff]  }
 0x11c   :  { %v2362_v24 = vadd.f32 %v4304_v47, %v2314_v25  ;;  %v4889_v25 = vld [vmem:[%s6175_s7 + $0x140] ss:$8 sps:$4 sm:$0xff]   ;;  %3715 = vmatprep.subr.bf16.mxu1 %v4894_v19  ;;  %v4897_v47 = vld [vmem:[%s6175_s7 + $0x154] ss:$8 sps:$4 sm:$0xff]   ;;  %v4943_v19 = vld [vmem:[%s6175_s7 + $0x1d0] ss:$8 sps:$4 sm:$0xff]  }
 0x11d   :  { %v4277_v40 = vpop.f32.mrb[4].mxu0  ;;  %3755 = vmatpush1.bf16.msra.mxu0 %v4889_v25  ;;  %v4948_v25 = vld [vmem:[%s6175_s7 + $0xe4] ss:$8 sps:$4 sm:$0xff]  }
 0x11e   :  { %v4278_v20 = vpop.f32.mrb[5].mxu0  ;;  %v4305_v16 = vpop.f32.mrb[4].mxu1  ;;  %3756 = vmatprep.subr.bf16.mxu0 %v4897_v47  ;;  %v4946_v47 = vld [vmem:[%s6175_s7 + $0xe0] ss:$8 sps:$4 sm:$0xff]  }
 0x11f   :  { %v4279_v63 = vadd.f32 %v4278_v20, %v4277_v40  ;;  %v4280_v37 = vpop.f32.mrb[6].mxu0  ;;  %v4306_v61 = vpop.f32.mrb[5].mxu1  ;;  %v4900_v40 = vld [vmem:[%s6175_s7 + $0x64] ss:$8 sps:$4 sm:$0xff]   ;;  %v4898_v20 = vld [vmem:[%s6175_s7 + $0x60] ss:$8 sps:$4 sm:$0xff]  }
 0x120   :  { %v4281_v32 = vpop.f32.mrb[7].mxu0  ;;  %v4307_v5 = vadd.f32 %v4306_v61, %v4305_v16  ;;  %v4308_v44 = vpop.f32.mrb[6].mxu1  ;;  %v4901_v37 = vld [vmem:[%s6175_s7 + $0x160] ss:$8 sps:$4 sm:$0xff]   ;;  %v4909_v61 = vld [vmem:[%s6175_s7 + $0x174] ss:$8 sps:$4 sm:$0xff]  }
 0x121   :  { %v2319_v9 = vadd.f32 %v4279_v63, %v3963_v29  ;;  %v4309_v28 = vpop.f32.mrb[7].mxu1  ;;  %v4903_v63 = vld [vmem:[%s6175_s7 + $0x164] ss:$8 sps:$4 sm:$0xff]   ;;  %v4906_v32 = vld [vmem:[%s6175_s7 + $0x74] ss:$8 sps:$4 sm:$0xff]  }
 0x123   :  { %v2367_v31 = vadd.f32 %v4307_v5, %v2319_v9  ;;  %v4904_v9 = vld [vmem:[%s6175_s7 + $0x70] ss:$8 sps:$4 sm:$0xff]  }
 0x132   :  { %v4327_v54 = vpop.f32.mrb[8].mxu0 }
 0x133   :  { %v4328_v21 = vpop.f32.mrb[9].mxu0 }
 0x134   :  { %v4329_v11 = vadd.f32 %v4328_v21, %v4327_v54  ;;  %v4330_v10 = vpop.f32.mrb[10].mxu0 }
 0x135   :  { %v4331_v56 = vpop.f32.mrb[11].mxu0 }
 0x136   :  { %v4355_v48 = vpop.f32.mrb[8].mxu1  ;;  %v2407_v59 = vadd.f32 %v4329_v11, %v2359_v27  ;;  %v4332_v57 = vadd.f32 %v4331_v56, %v4330_v10  ;;  %v4892_v27 = vld [vmem:[%s6175_s7 + $0x50] ss:$8 sps:$4 sm:$0xff]   ;;  %v4913_v11 = vld [vmem:[%s6175_s7 + $0x180] ss:$8 sps:$4 sm:$0xff]  }
 0x137   :  { %v4356_v53 = vpop.f32.mrb[9].mxu1  ;;  %3716 = vmatpush1.bf16.msra.mxu1 %v4892_v27  ;;  %v4951_v27 = vld [vmem:[%s6175_s7 + $0x1e4] ss:$8 sps:$4 sm:$0xff]  }
 0x138   :  { %v4357_v22 = vadd.f32 %v4356_v53, %v4355_v48  ;;  %v4358_v30 = vpop.f32.mrb[10].mxu1  ;;  %v2410_v49 = vadd.f32 %v4332_v57, %v2362_v24  ;;  %v4895_v24 = vld [vmem:[%s6175_s7 + $0x150] ss:$8 sps:$4 sm:$0xff]   ;;  %3717 = vmatprep.subr.bf16.mxu1 %v4900_v40  ;;  %v4918_v48 = vld [vmem:[%s6175_s7 + $0x94] ss:$8 sps:$4 sm:$0xff]  }
 0x139   :  { %v4359_v8 = vpop.f32.mrb[11].mxu1  ;;  %3757 = vmatpush1.bf16.msra.mxu0 %v4895_v24  ;;  %v4921_v57 = vld [vmem:[%s6175_s7 + $0x194] ss:$8 sps:$4 sm:$0xff]   ;;  %v4949_v40 = vld [vmem:[%s6175_s7 + $0x1e0] ss:$8 sps:$4 sm:$0xff]  }
 0x13a   :  { %v5820_v14 = vadd.f32 %v4357_v22, %v2407_v59  ;;  %v4360_v6 = vadd.f32 %v4359_v8, %v4358_v30  ;;  %v4333_v41 = vpop.f32.mrb[12].mxu0  ;;  %3758 = vmatprep.subr.bf16.mxu0 %v4903_v63  ;;  %v4916_v59 = vld [vmem:[%s6175_s7 + $0x90] ss:$8 sps:$4 sm:$0xff]   ;;  %v4954_v24 = vld [vmem:[%s6175_s7 + $0xf4] ss:$8 sps:$4 sm:$0xff]  }
 0x13b   :  { %v4334_v23 = vpop.f32.mrb[13].mxu0  ;;  %3718 = vmatpush1.bf16.msra.mxu1 %v4898_v20  ;;  %v4957_v20 = vld [vmem:[%s6175_s7 + $0x1f4] ss:$8 sps:$4 sm:$0xff]   ;;  %v4952_v63 = vld [vmem:[%s6175_s7 + $0xf0] ss:$8 sps:$4 sm:$0xff]  }
 0x13c   :  { %v5828_v62 = vadd.f32 %v4360_v6, %v2410_v49  ;;  %v4335_v26 = vadd.f32 %v4334_v23, %v4333_v41  ;;  %v4336_v35 = vpop.f32.mrb[14].mxu0  ;;  %3719 = vmatprep.subr.bf16.mxu1 %v4906_v32 }
 0x13d   :  { %v4337_v18 = vpop.f32.mrb[15].mxu0  ;;  %3759 = vmatpush1.bf16.msra.mxu0 %v4901_v37  ;;  %v4955_v37 = vld [vmem:[%s6175_s7 + $0x1f0] ss:$8 sps:$4 sm:$0xff]  }
 0x13e   :  { %v4361_v29 = vpop.f32.mrb[12].mxu1  ;;  %v2415_v38 = vadd.f32 %v4335_v26, %v2367_v31  ;;  %3760 = vmatprep.subr.bf16.mxu0 %v4909_v61  ;;  %v4925_v26 = vld [vmem:[%s6175_s7 + $0x1a0] ss:$8 sps:$4 sm:$0xff]   ;;  %v4928_v18 = vld [vmem:[%s6175_s7 + $0xb0] ss:$8 sps:$4 sm:$0xff]  }
 0x13f   :  { %v4362_v2 = vpop.f32.mrb[13].mxu1  ;;  %3720 = vmatpush1.bf16.msra.mxu1 %v4904_v9 }
 0x140   :  { %v4363_v42 = vadd.f32 %v4362_v2, %v4361_v29  ;;  %v4364_v0 = vpop.f32.mrb[14].mxu1  ;;  %3721 = vmatprep.subr.bf16.mxu1 %v4912_v13  ;;  %v4933_v2 = vld [vmem:[%s6175_s7 + $0x1b4] ss:$8 sps:$4 sm:$0xff]  }
 0x141   :  { %v4365_v15 = vpop.f32.mrb[15].mxu1  ;;  %3761 = vmatpush1.bf16.msra.mxu0 %v4907_v12  ;;  %v4936_v0 = vld [vmem:[%s6175_s7 + $0xc4] ss:$8 sps:$4 sm:$0xff]  }
 0x142   :  { %v5836_v33 = vadd.f32 %v4363_v42, %v2415_v38  ;;  %3762 = vmatprep.subr.bf16.mxu0 %v4915_v36  ;;  %v4931_v38 = vld [vmem:[%s6175_s7 + $0x1b0] ss:$8 sps:$4 sm:$0xff]   ;;  %v4934_v42 = vld [vmem:[%s6175_s7 + $0xc0] ss:$8 sps:$4 sm:$0xff]   ;;  %v4939_v15 = vld [vmem:[%s6175_s7 + $0x1c4] ss:$8 sps:$4 sm:$0xff]  }
 0x143   :  { %3722 = vmatpush1.bf16.msra.mxu1 %v4910_v4 }
 0x144   :  { %3723 = vmatprep.subr.bf16.mxu1 %v4918_v48 }
 0x145   :  { %3763 = vmatpush1.bf16.msra.mxu0 %v4913_v11 }
 0x146   :  { %3764 = vmatprep.subr.bf16.mxu0 %v4921_v57 }
 0x147   :  { %3724 = vmatpush1.bf16.msra.mxu1 %v4916_v59 }
 0x148   :  { %3725 = vmatprep.subr.bf16.mxu1 %v4924_v46 }
 0x149   :  { %3765 = vmatpush1.bf16.msra.mxu0 %v4919_v1 }
 0x14b   :  { %3726 = vmatpush1.bf16.msra.mxu1 %v4922_v39 }
 0x14c   :  { %3727 = vmatprep.subr.bf16.mxu1 %v4930_v43 }
 0x14f   :  { %3728 = vmatpush1.bf16.msra.mxu1 %v4928_v18 }
 0x150   :  { %3729 = vmatprep.subr.bf16.mxu1 %v4936_v0 }
 0x153   :  { %v4383_v16 = vpop.f32.mrb[16].mxu0  ;;  %3730 = vmatpush1.bf16.msra.mxu1 %v4934_v42 }
 0x154   :  { %v4384_v7 = vpop.f32.mrb[17].mxu0 }
 0x155   :  { %v4385_v5 = vadd.f32 %v4384_v7, %v4383_v16  ;;  %v4386_v44 = vpop.f32.mrb[18].mxu0 }
 0x156   :  { %v4411_v34 = vpop.f32.mrb[16].mxu1  ;;  %v4387_v28 = vpop.f32.mrb[19].mxu0 }
 0x157   :  { %v2503_v31 = vadd.f32 %v4385_v5, %v5820_v14  ;;  %v4412_v45 = vpop.f32.mrb[17].mxu1  ;;  %v4388_v55 = vadd.f32 %v4387_v28, %v4386_v44 }
 0x158   :  { %v4413_v54 = vadd.f32 %v4412_v45, %v4411_v34  ;;  %v4414_v21 = vpop.f32.mrb[18].mxu1  ;;  %v3805_v45 = vld [vmem:[%s6177_s9 + $0x80] sm:$0xff] }
 0x159   :  { %v2506_v10 = vadd.f32 %v4388_v55, %v5828_v62  ;;  %v4415_v58 = vpop.f32.mrb[19].mxu1  ;;  %v4927_v62 = vld [vmem:[%s6175_s7 + $0x1a4] ss:$8 sps:$4 sm:$0xff]  }
 0x15a   :  { %v5903_v56 = vadd.f32 %v4413_v54, %v2503_v31  ;;  %v4416_v50 = vadd.f32 %v4415_v58, %v4414_v21  ;;  %3766 = vmatprep.subr.bf16.mxu0 %v4927_v62  ;;  %v3806_v55 = vld [vmem:[%s6177_s9 + $0x88] sm:$0xff] }
 0x15b   :  { %v4389_v53 = vpop.f32.mrb[20].mxu0  ;;  %3767 = vmatpush1.bf16.msra.mxu0 %v4925_v26  ;;  %v4626_v21 = vpack.c.bf16 %v3806_v55, %v3805_v45 }
 0x15c   :  { %v5911_v22 = vadd.f32 %v4416_v50, %v2506_v10  ;;  %v4390_v30 = vpop.f32.mrb[21].mxu0  ;;  %3768 = vmatprep.subr.bf16.mxu0 %v4933_v2 }
 0x15d   :  { %v4391_v49 = vadd.f32 %v4390_v30, %v4389_v53  ;;  %v4392_v8 = vpop.f32.mrb[22].mxu0 }
 0x15e   :  { %v4417_v14 = vpop.f32.mrb[20].mxu1  ;;  %v4393_v6 = vpop.f32.mrb[23].mxu0 }
 0x15f   :  { %v2511_v41 = vadd.f32 %v4391_v49, %v5836_v33  ;;  %v4418_v3 = vpop.f32.mrb[21].mxu1  ;;  %v4942_v33 = vld [vmem:[%s6175_s7 + $0xd4] ss:$8 sps:$4 sm:$0xff]   ;;  %3769 = vmatpush1.bf16.msra.mxu0 %v4931_v38 }
 0x160   :  { %v4419_v23 = vadd.f32 %v4418_v3, %v4417_v14  ;;  %v4420_v17 = vpop.f32.mrb[22].mxu1  ;;  %3770 = vmatprep.subr.bf16.mxu0 %v4939_v15  ;;  %3731 = vmatprep.subr.bf16.mxu1 %v4942_v33 }
 0x161   :  { %v4421_v35 = vpop.f32.mrb[23].mxu1  ;;  %3732 = vmatpush1.bf16.msra.mxu1 %v4940_v60 }
 0x162   :  { %v5932_v29 = vadd.f32 %v4419_v23, %v2511_v41  ;;  %3733 = vmatprep.subr.bf16.mxu1 %v4948_v25 }
 0x163   :  { %3771 = vmatpush1.bf16.msra.mxu0 %v4937_v51 }
 0x164   :  { %3772 = vmatprep.subr.bf16.mxu0 %v4945_v52 }
 0x165   :  { %3734 = vmatpush1.bf16.msra.mxu1 %v4946_v47 }
 0x166   :  { %3735 = vmatprep.subr.bf16.mxu1 %v4954_v24  ;;  %v5012_v24 = vmov 1966171168  }
 0x167   :  { %3773 = vmatpush1.bf16.msra.mxu0 %v4943_v19 }
 0x168   :  { %3774 = vmatprep.subr.bf16.mxu0 %v4951_v27 }
 0x169   :  { %3736 = vmatpush1.bf16.msra.mxu1 %v4952_v63 }
 0x16a   :  { %4627 = vmatprep.subr.bf16.mxu1 %v4626_v21 }
 0x16b   :  { %3775 = vmatpush1.bf16.msra.mxu0 %v4949_v40  ;;  %v2860_v40 = vunpack.c.l.s4 %v5012_v24 }
 0x16c   :  { %3776 = vmatprep.subr.bf16.mxu0 %v4957_v20 }
 0x16f   :  { %3777 = vmatpush1.bf16.msra.mxu0 %v4955_v37 }
 0x173   :  { %v4439_v32 = vpop.f32.mrb[24].mxu0 }
 0x174   :  { %v4440_v9 = vpop.f32.mrb[25].mxu0 }
 0x175   :  { %v4441_v16 = vadd.f32 %v4440_v9, %v4439_v32  ;;  %v4442_v61 = vpop.f32.mrb[26].mxu0  ;;  %v2861_v9 = vunpack.c.0.s8 %v2860_v40 }
 0x176   :  { %v4467_v7 = vpop.f32.mrb[24].mxu1  ;;  %v4443_v12 = vpop.f32.mrb[27].mxu0 }
 0x177   :  { %v2599_v5 = vadd.f32 %v4441_v16, %v5903_v56  ;;  %v4468_v44 = vpop.f32.mrb[25].mxu1  ;;  %v4444_v13 = vadd.f32 %v4443_v12, %v4442_v61 }
 0x178   :  { %v4469_v34 = vadd.f32 %v4468_v44, %v4467_v7  ;;  %v4470_v28 = vpop.f32.mrb[26].mxu1 }
 0x179   :  { %v2602_v4 = vadd.f32 %v4444_v13, %v5911_v22  ;;  %v4471_v31 = vpop.f32.mrb[27].mxu1 }
 0x17a   :  { %v2647_v36 = vadd.f32 %v4469_v34, %v2599_v5  ;;  %v4472_v54 = vadd.f32 %v4471_v31, %v4470_v28 }
 0x17b   :  { %v4445_v11 = vpop.f32.mrb[28].mxu0 }
 0x17c   :  { %v2650_v10 = vadd.f32 %v4472_v54, %v2602_v4  ;;  %v4446_v58 = vpop.f32.mrb[29].mxu0  ;;  %v6202_v4 = vld [vmem:[#allocation8_spill] sm:$0xff] }
 0x17d   :  { %v4447_v48 = vadd.f32 %v4446_v58, %v4445_v11  ;;  %v4448_v56 = vpop.f32.mrb[30].mxu0  ;;  %v6001_v31 = vsub.s32 %v2861_v9, %v6202_v4 }
 0x17e   :  { %v4473_v50 = vpop.f32.mrb[28].mxu1  ;;  %v4449_v59 = vpop.f32.mrb[31].mxu0 }
 0x17f   :  { %v2607_v53 = vadd.f32 %v4447_v48, %v5932_v29  ;;  %v4474_v57 = vpop.f32.mrb[29].mxu1 }
 0x180   :  { %v4475_v22 = vadd.f32 %v4474_v57, %v4473_v50  ;;  %v4476_v30 = vpop.f32.mrb[30].mxu1 }
 0x181   :  { %v4477_v1 = vpop.f32.mrb[31].mxu1 }
 0x182   :  { %v2655_v49 = vadd.f32 %v4475_v22, %v2607_v53 }
 0x193   :  { %v4495_v8 = vpop.f32.mrb[32].mxu0 }
 0x194   :  { %v4496_v46 = vpop.f32.mrb[33].mxu0 }
 0x195   :  { %v4497_v14 = vadd.f32 %v4496_v46, %v4495_v8  ;;  %v4498_v6 = vpop.f32.mrb[34].mxu0 }
 0x196   :  { %v4523_v39 = vpop.f32.mrb[32].mxu1  ;;  %v4499_v41 = vpop.f32.mrb[35].mxu0 }
 0x197   :  { %v2695_v3 = vadd.f32 %v4497_v14, %v2647_v36  ;;  %v4524_v62 = vpop.f32.mrb[33].mxu1  ;;  %v4500_v23 = vadd.f32 %v4499_v41, %v4498_v6 }
 0x198   :  { %v4525_v17 = vadd.f32 %v4524_v62, %v4523_v39  ;;  %v4526_v26 = vpop.f32.mrb[34].mxu1 }
 0x199   :  { %v2698_v35 = vadd.f32 %v4500_v23, %v2650_v10  ;;  %v4527_v43 = vpop.f32.mrb[35].mxu1 }
 0x19a   :  { %v2743_v18 = vadd.f32 %v4525_v17, %v2695_v3  ;;  %v4528_v29 = vadd.f32 %v4527_v43, %v4526_v26 }
 0x19b   :  { %v4501_v38 = vpop.f32.mrb[36].mxu0 }
 0x19c   :  { %v2746_v2 = vadd.f32 %v4528_v29, %v2698_v35  ;;  %v4502_v42 = vpop.f32.mrb[37].mxu0 }
 0x19d   :  { %v4503_v0 = vadd.f32 %v4502_v42, %v4501_v38  ;;  %v4504_v15 = vpop.f32.mrb[38].mxu0 }
 0x19e   :  { %v4529_v33 = vpop.f32.mrb[36].mxu1  ;;  %v4505_v51 = vpop.f32.mrb[39].mxu0 }
 0x19f   :  { %v2703_v52 = vadd.f32 %v4503_v0, %v2655_v49  ;;  %v4530_v60 = vpop.f32.mrb[37].mxu1 }
 0x1a0   :  { %v4531_v25 = vadd.f32 %v4530_v60, %v4529_v33  ;;  %v4532_v19 = vpop.f32.mrb[38].mxu1 }
 0x1a1   :  { %v4533_v27 = vpop.f32.mrb[39].mxu1 }
 0x1a2   :  { %v2751_v47 = vadd.f32 %v4531_v25, %v2703_v52 }
 0x1b3   :  { %v4551_v20 = vpop.f32.mrb[40].mxu0 }
 0x1b4   :  { %v4552_v63 = vpop.f32.mrb[41].mxu0 }
 0x1b5   :  { %v4553_v37 = vadd.f32 %v4552_v63, %v4551_v20  ;;  %v4554_v32 = vpop.f32.mrb[42].mxu0 }
 0x1b6   :  { %v4579_v16 = vpop.f32.mrb[40].mxu1  ;;  %v4555_v61 = vpop.f32.mrb[43].mxu0 }
 0x1b7   :  { %v2791_v7 = vadd.f32 %v4553_v37, %v2743_v18  ;;  %v4580_v12 = vpop.f32.mrb[41].mxu1  ;;  %v4556_v5 = vadd.f32 %v4555_v61, %v4554_v32 }
 0x1b8   :  { %v4581_v44 = vadd.f32 %v4580_v12, %v4579_v16  ;;  %v4582_v13 = vpop.f32.mrb[42].mxu1 }
 0x1b9   :  { %v2794_v34 = vadd.f32 %v4556_v5, %v2746_v2  ;;  %v4583_v28 = vpop.f32.mrb[43].mxu1 }
 0x1ba   :  { %v2839_v45 = vadd.f32 %v4581_v44, %v2791_v7  ;;  %v4584_v55 = vadd.f32 %v4583_v28, %v4582_v13 }
 0x1bb   :  { %v4557_v36 = vpop.f32.mrb[44].mxu0 }
 0x1bc   :  { %v2852_v54 = vmax.f32 %v2839_v45, 0.0  ;;  %v2842_v21 = vadd.f32 %v4584_v55, %v2794_v34  ;;  %v4558_v11 = vpop.f32.mrb[45].mxu0 }
 0x1bd   :  { %v4559_v10 = vadd.f32 %v4558_v11, %v4557_v36  ;;  %v4560_v58 = vpop.f32.mrb[46].mxu0 }
 0x1be   :  { %v2858_v48 = vcombine.high %v2852_v54, %v2852_v54  ;;  %v2865_v56 = vrot.slane %v2852_v54, %v6001_v31  ;;  %v2853_v50 = vmax.f32 %v2842_v21, 0.0  ;;  %v4585_v59 = vpop.f32.mrb[44].mxu1  ;;  %v4561_v53 = vpop.f32.mrb[47].mxu0 }
 0x1bf   :  { %v2799_v57 = vadd.f32 %v4559_v10, %v2751_v47  ;;  %v4586_v22 = vpop.f32.mrb[45].mxu1 }
 0x1c0   :  { %v2872_v30 = vrot.slane %v2858_v48, %v6001_v31  ;;  %v2873_v1 = vcombine.high %v2865_v56, %v2865_v56  ;;  %v2881_v49 = vrot.slane %v2865_v56, %v6001_v31  ;;  %v2907_v8 = vcombine.high %v2853_v50, %v2853_v50  ;;  %v4588_v46 = vpop.f32.mrb[46].mxu1 }
 0x1c1   :  { %v2914_v14 = vrot.slane %v2853_v50, %v6001_v31  ;;  %v4587_v6 = vadd.f32 %v4586_v22, %v4585_v59  ;;  %v4589_v39 = vpop.f32.mrb[47].mxu1 }
 0x1c2   :  { %v2874_v41 = vcombine.high %v2872_v30, %v2872_v30  ;;  %v2888_v3 = vrot.slane %v2872_v30, %v6001_v31  ;;  %v2895_v62 = vrot.slane %v2873_v1, %v6001_v31  ;;  %v2903_v23 = vcombine.high %v2881_v49, %v2881_v49 }
 0x1c3   :  { %v2921_v17 = vrot.slane %v2907_v8, %v6001_v31  ;;  %v2922_v26 = vcombine.high %v2914_v14, %v2914_v14  ;;  %v2930_v35 = vrot.slane %v2914_v14, %v6001_v31  ;;  %v2847_v43 = vadd.f32 %v4587_v6, %v2799_v57 }
 0x1c4   :  { %v2902_v18 = vrot.slane %v2874_v41, %v6001_v31  ;;  %v2905_v29 = vcombine.high %v2895_v62, %v2895_v62  ;;  %v3005_v38 = vcombine.low %v2881_v49, %v2895_v62  ;;  %v3019_v2 = vrot.slane %v2903_v23, %v6001_v31 }
 0x1c5   :  { %v2923_v42 = vcombine.high %v2921_v17, %v2921_v17  ;;  %v2937_v0 = vrot.slane %v2921_v17, %v6001_v31  ;;  %v2944_v15 = vrot.slane %v2922_v26, %v6001_v31  ;;  %v2952_v33 = vcombine.high %v2930_v35, %v2930_v35 }
 0x1c6   :  { %v3012_v51 = vrot.slane %v3005_v38, %v6001_v31  ;;  %v3028_v52 = vcombine.low %v2905_v29, %v2888_v3  ;;  %v3042_v60 = vrot.slane %v2902_v18, %v6001_v31  ;;  %v4188_v25 = vcombine.high %v2888_v3, %v2902_v18 }
 0x1c7   :  { %v2951_v19 = vrot.slane %v2923_v42, %v6001_v31  ;;  %v2953_v27 = vcombine.high %v2937_v0, %v2937_v0  ;;  %v2954_v47 = vcombine.high %v2944_v15, %v2944_v15  ;;  %v3065_v24 = vrot.slane %v2930_v35, %v6001_v31 }
 0x1c8   :  { %v3020_v40 = vcombine.low %v3012_v51, %v3019_v2  ;;  %v3035_v20 = vrot.slane %v3028_v52, %v6001_v31  ;;  %v3058_v63 = vrot.slane %v4188_v25, %v6001_v31  ;;  %v3074_v37 = vcombine.low %v2944_v15, %v2952_v33 }
 0x1c9   :  { %v3088_v32 = vrot.slane %v2954_v47, %v6001_v31  ;;  %v3097_v9 = vcombine.low %v2937_v0, %v2951_v19  ;;  %v3111_v16 = vrot.slane %v2953_v27, %v6001_v31  ;;  %v2854_v61 = vmax.f32 %v2847_v43, 0.0 }
 0x1ca   :  { %v3027_v7 = vrot.slane %v3020_v40, %v6001_v31  ;;  %v3043_v12 = vcombine.low %v3035_v20, %v3042_v60  ;;  %v3066_v5 = vcombine.low %v3058_v63, %v3065_v24  ;;  %v3081_v44 = vrot.slane %v3074_v37, %v6001_v31 }
 0x1cb   :  { %v3104_v13 = vrot.slane %v3097_v9, %v6001_v31  ;;  %v2955_v34 = vcombine.high %v2951_v19, %v2951_v19  ;;  %v2956_v28 = vcombine.high %v2854_v61, %v2854_v61  ;;  %v2963_v45 = vrot.slane %v2854_v61, %v6001_v31 }
 0x1cc   :  { %v3050_v55 = vrot.slane %v3043_v12, %v6001_v31  ;;  %v3197_v36 = vsel %vm420_vm5, %v3027_v7, -inf  ;;  %v3073_v54 = vrot.slane %v3066_v5, %v6001_v31  ;;  %v3089_v21 = vcombine.low %v3081_v44, %v3088_v32 }
 0x1cd   :  { %v3198_v11 = vrot.slane %v3197_v36, 4  ;;  %v3112_v10 = vcombine.low %v3104_v13, %v3111_v16  ;;  %v2970_v58 = vrot.slane %v2956_v28, %v6001_v31  ;;  %v2971_v48 = vcombine.high %v2963_v45, %v2963_v45 }
 0x1ce   :  { %v3204_v56 = vsel %vm420_vm5, %v3050_v55, -inf  ;;  %v3096_v50 = vrot.slane %v3089_v21, %v6001_v31  ;;  %v3211_v59 = vsel %vm420_vm5, %v3073_v54, -inf  ;;  %v2979_v53 = vrot.slane %v2963_v45, %v6001_v31 }
 0x1cf   :  { %v3199_v57 = vmax.f32 %v3197_v36, %v3198_v11  ;;  %v3205_v22 = vrot.slane %v3204_v56, 4  ;;  %v3119_v30 = vrot.slane %v3112_v10, %v6001_v31  ;;  %v3212_v1 = vrot.slane %v3211_v59, 4 }
 0x1d0   :  { %v3218_v49 = vsel %vm420_vm5, %v3096_v50, -inf  ;;  %v2972_v8 = vcombine.high %v2970_v58, %v2970_v58  ;;  %v2986_v46 = vrot.slane %v2970_v58, %v6001_v31  ;;  %v2993_v14 = vrot.slane %v2971_v48, %v6001_v31 }
 0x1d1   :  { %v3200_v6 = vrot.slane %v3199_v57, 2  ;;  %v3206_v39 = vmax.f32 %v3204_v56, %v3205_v22  ;;  %v3213_v41 = vmax.f32 %v3211_v59, %v3212_v1  ;;  %v3219_v3 = vrot.slane %v3218_v49, 4 }
 0x1d2   :  { %v3225_v62 = vsel %vm420_vm5, %v3119_v30, -inf  ;;  %v3000_v23 = vrot.slane %v2972_v8, %v6001_v31  ;;  %v3002_v17 = vcombine.high %v2986_v46, %v2986_v46  ;;  %v3120_v26 = vcombine.low %v2955_v34, %v2979_v53 }
 0x1d3   :  { %v3201_v35 = vmax.f32 %v3199_v57, %v3200_v6  ;;  %v3207_v43 = vrot.slane %v3206_v39, 2  ;;  %v3214_v18 = vrot.slane %v3213_v41, 2  ;;  %v3220_v29 = vmax.f32 %v3218_v49, %v3219_v3 }
 0x1d4   :  { %v3226_v38 = vrot.slane %v3225_v62, 4  ;;  %v3004_v2 = vcombine.high %v3000_v23, %v3000_v23  ;;  %v3127_v42 = vrot.slane %v3120_v26, %v6001_v31  ;;  %v3134_v0 = vrot.slane %v2993_v14, %v6001_v31 }
 0x1d5   :  { %v3202_v15 = vrot.slane %v3201_v35, 1  ;;  %v3208_v33 = vmax.f32 %v3206_v39, %v3207_v43  ;;  %v3215_v51 = vmax.f32 %v3213_v41, %v3214_v18  ;;  %v3221_v52 = vrot.slane %v3220_v29, 2 }
 0x1d6   :  { %v3227_v60 = vmax.f32 %v3225_v62, %v3226_v38  ;;  %v3135_v25 = vcombine.low %v3127_v42, %v3134_v0  ;;  %v4189_v19 = vcombine.high %v2979_v53, %v2993_v14  ;;  %v3157_v27 = vrot.slane %v2986_v46, %v6001_v31 }
 0x1d7   :  { %v3203_v47 = vmax.f32 %v3201_v35, %v3202_v15  ;;  %v3209_v24 = vrot.slane %v3208_v33, 1  ;;  %v3216_v40 = vrot.slane %v3215_v51, 1  ;;  %v3222_v20 = vmax.f32 %v3220_v29, %v3221_v52 }
 0x1d8   :  { %v3228_v63 = vrot.slane %v3227_v60, 2  ;;  %v3142_v37 = vrot.slane %v3135_v25, %v6001_v31  ;;  %v3150_v32 = vrot.slane %v4189_v19, %v6001_v31  ;;  %v3166_v9 = vcombine.low %v3000_v23, %v3002_v17  ;;  %v3789_v25 = vld [vmem:[%s6177_s9] sm:$0xff]  ;;  %v3790_v19 = vld [vmem:[%s6177_s9 + $0x8] sm:$0xff] }
 0x1d9   :  { %v3210_v16 = vmax.f32 %v3208_v33, %v3209_v24  ;;  %v3217_v61 = vmax.f32 %v3215_v51, %v3216_v40  ;;  %v3223_v7 = vrot.slane %v3222_v20, 1  ;;  %v3180_v12 = vrot.slane %v3004_v2, %v6001_v31  ;;  %v3807_v24 = vld [vmem:[%s6177_s9 + $0x90] sm:$0xff] }
 0x1da   :  { %v3229_v5 = vmax.f32 %v3227_v60, %v3228_v63  ;;  %v3158_v44 = vcombine.low %v3150_v32, %v3157_v27  ;;  %v3173_v13 = vrot.slane %v3166_v9, %v6001_v31  ;;  %v3232_v34 = vsel %vm420_vm5, %v3142_v37, -inf  ;;  %v3791_v9 = vld [vmem:[%s6177_s9 + $0x10] sm:$0xff] }
 0x1db   :  { %v3233_v28 = vrot.slane %v3232_v34, 4  ;;  %v3224_v45 = vmax.f32 %v3222_v20, %v3223_v7  ;;  %v3262_v55 = vsel %vm3261_vm6, %v3210_v16, %v3203_v47  ;;  %v5013_v8 = vmov 1935823168   ;;  %v3792_v16 = vld [vmem:[%s6177_s9 + $0x18] sm:$0xff]  ;;  %v3809_v7 = vld [vmem:[%s6177_s9 + $0xa0] sm:$0xff] }
 0x1dc   :  { %v3165_v36 = vrot.slane %v3158_v44, %v6001_v31  ;;  %v3181_v54 = vcombine.low %v3173_v13, %v3180_v12  ;;  %v3230_v21 = vrot.slane %v3229_v5, 1  ;;  %v3264_v11 = vsel %vm3263_vm7, %v3217_v61, %v3262_v55  ;;  %v3810_v12 = vld [vmem:[%s6177_s9 + $0xa8] sm:$0xff]  ;;  %v3812_v55 = vld [vmem:[%s6177_s9 + $0xb8] sm:$0xff] }
 0x1dd   :  { %v3234_v10 = vmax.f32 %v3232_v34, %v3233_v28  ;;  %v3266_v58 = vsel %vm3265_vm8, %v3224_v45, %v3264_v11  ;;  %v3277_v46 = vunpack.c.l.s4 %v5013_v8  ;;  %v5014_v41 = vmov 1983009808   ;;  %v3793_v34 = vld [vmem:[%s6177_s9 + $0x20] sm:$0xff]  ;;  %v3794_v28 = vld [vmem:[%s6177_s9 + $0x28] sm:$0xff]  ;;  %v3811_v45 = vld [vmem:[%s6177_s9 + $0xb0] sm:$0xff] }
 0x1de   :  { %v3188_v48 = vrot.slane %v3181_v54, %v6001_v31  ;;  %v3239_v56 = vsel %vm420_vm5, %v3165_v36, -inf  ;;  %v3231_v50 = vmax.f32 %v3229_v5, %v3230_v21  ;;  %v3286_v3 = vunpack.c.l.s4 %v5014_v41  ;;  %v3795_v21 = vld [vmem:[%s6177_s9 + $0x30] sm:$0xff]  ;;  %v3796_v11 = vld [vmem:[%s6177_s9 + $0x38] sm:$0xff]  ;;  %v3802_v41 = vld [vmem:[%s6177_s9 + $0x68] sm:$0xff] }
 0x1df   :  { %v3235_v59 = vrot.slane %v3234_v10, 2  ;;  %v3240_v53 = vrot.slane %v3239_v56, 4  ;;  %v3278_v17 = vunpack.c.0.s8 %v3277_v46  ;;  %v4628_v63 = vpack.c.bf16 %v3790_v19, %v3789_v25  ;;  %v3817_v46 = vld [vmem:[%s6177_s9 + $0xe0] sm:$0xff] }
 0x1e0   :  { %v3246_v57 = vsel %vm420_vm5, %v3188_v48, -inf  ;;  %v3268_v22 = vsel %vm3267_vm9, %v3231_v50, %v3266_v58  ;;  %v3287_v18 = vunpack.c.0.s8 %v3286_v3  ;;  %v4632_v44 = vpack.c.bf16 %v3792_v16, %v3791_v9  ;;  %v3814_v58 = vld [vmem:[%s6177_s9 + $0xc8] sm:$0xff]  ;;  %v3797_v50 = vld [vmem:[%s6177_s9 + $0x40] sm:$0xff] }
 0x1e1   :  { %v3236_v30 = vmax.f32 %v3234_v10, %v3235_v59  ;;  %v3241_v1 = vmax.f32 %v3239_v56, %v3240_v53  ;;  %v3247_v49 = vrot.slane %v3246_v57, 4  ;;  %v3281_v2 = vsub.s32 %v3278_v17, %v6202_v4  ;;  %v3813_v10 = vld [vmem:[%s6177_s9 + $0xc0] sm:$0xff]  ;;  %v3798_v59 = vld [vmem:[%s6177_s9 + $0x48] sm:$0xff]  ;;  %v3815_v53 = vld [vmem:[%s6177_s9 + $0xd0] sm:$0xff] }
 0x1e2   :  { %v3290_v15 = vsub.s32 %v3287_v18, %v6202_v4  ;;  %v3808_v4 = vld [vmem:[%s6177_s9 + $0x98] sm:$0xff]  ;;  %v4634_v13 = vpack.c.bf16 %v3810_v12, %v3809_v7  ;;  %v4636_v36 = vpack.c.bf16 %v3794_v28, %v3793_v34  ;;  %v4638_v54 = vpack.c.bf16 %v3812_v55, %v3811_v45  ;;  %v3803_v17 = vld [vmem:[%s6177_s9 + $0x70] sm:$0xff] }
 0x1e3   :  { %v3242_v14 = vrot.slane %v3241_v1, 2  ;;  %v3237_v6 = vrot.slane %v3236_v30, 1  ;;  %v3248_v39 = vmax.f32 %v3246_v57, %v3247_v49  ;;  %v4630_v32 = vpack.c.bf16 %v3808_v4, %v3807_v24  ;;  %v3816_v57 = vld [vmem:[%s6177_s9 + $0xd8] sm:$0xff] }
 0x1e4   :  { %v4640_v48 = vpack.c.bf16 %v3796_v11, %v3795_v21  ;;  %v4642_v56 = vpack.c.bf16 %v3814_v58, %v3813_v10  ;;  %v3800_v49 = vld [vmem:[%s6177_s9 + $0x58] sm:$0xff] }
 0x1e5   :  { %v3238_v31 = vmax.f32 %v3236_v30, %v3237_v6  ;;  %v3243_v62 = vmax.f32 %v3241_v1, %v3242_v14  ;;  %v3249_v23 = vrot.slane %v3248_v39, 2  ;;  %v4646_v30 = vpack.c.bf16 %v3816_v57, %v3815_v53  ;;  %v3799_v1 = vld [vmem:[%s6177_s9 + $0x50] sm:$0xff]  ;;  %v3818_v14 = vld [vmem:[%s6177_s9 + $0xe8] sm:$0xff] }
 0x1e6   :  { %v4648_v8 = vpack.c.bf16 %v3800_v49, %v3799_v1  ;;  %v4650_v6 = vpack.c.bf16 %v3818_v14, %v3817_v46  ;;  %v6203_v18 = vld [vmem:[#allocation10_spill] sm:$0xff] }
 0x1e7   :  { %v3244_v26 = vrot.slane %v3243_v62, 1  ;;  %v3250_v35 = vmax.f32 %v3248_v39, %v3249_v23  ;;  %v3270_v43 = vsel %vm3269_vm10, %v3238_v31, %v3268_v22  ;;  %v4644_v22 = vpack.c.bf16 %v3798_v59, %v3797_v50  ;;  %v3801_v39 = vld [vmem:[%s6177_s9 + $0x60] sm:$0xff]  ;;  %v3819_v31 = vld [vmem:[%s6177_s9 + $0xf0] sm:$0xff] }
 0x1e8   :  { %v4652_v3 = vpack.c.bf16 %v3802_v41, %v3801_v39 }
 0x1e9   :  { %v3245_v29 = vmax.f32 %v3243_v62, %v3244_v26  ;;  %v3251_v38 = vrot.slane %v3250_v35, 1  ;;  %v3820_v62 = vld [vmem:[%s6177_s9 + $0xf8] sm:$0xff] }
 0x1ea   :  { %v4654_v23 = vpack.c.bf16 %v3820_v62, %v3819_v31  ;;  %v3804_v26 = vld [vmem:[%s6177_s9 + $0x78] sm:$0xff] }
 0x1eb   :  { %v3252_v42 = vmax.f32 %v3250_v35, %v3251_v38  ;;  %v3272_v0 = vsel %vm3271_vm11, %v3245_v29, %v3270_v43  ;;  %v4656_v35 = vpack.c.bf16 %v3804_v26, %v3803_v17  ;;  %v3373_v43 = vld [vmem:[%s6176_s8] sm:$0x3]  ;;  %v6204_v38 = vld [vmem:[#allocation9_spill] sm:$0xff] }
 0x1ec   :  { %v3378_v29 = vrot.slane %v3373_v43, %v6203_v18 }
 0x1ed   :  { %v3274_v33 = vsel %vm3273_vm12, %v3252_v42, %v3272_v0 }
 0x1ee   :  { %v3282_v51 = vrot.slane %v3274_v33, %v3281_v2  ;;  %v3382_v2 = vrot.slane %v3373_v43, %v6204_v38 }
 0x1f0   :  { %v3291_v52 = vrot.slane %v3282_v51, %v3290_v15  ;;  %v3284_v60 = vcombine.high %v3282_v51, %v3282_v51 }
 0x1f2   :  { %v3299_v27 = vcombine.high %v3291_v52, %v3291_v52  ;;  %v3298_v47 = vrot.slane %v3284_v60, %v3290_v15  ;;  %v3305_v37 = vpack.c.bf16 %v3291_v52, %v3291_v52 }
 0x1f4   :  { %v3306_v40 = vpack.c.bf16 %v3299_v27, %v3299_v27  ;;  %v3300_v20 = vcombine.high %v3298_v47, %v3298_v47  ;;  %v3307_v5 = vpack.c.bf16 %v3298_v47, %v3298_v47 }
 0x1f6   :  { %3737 = vmatprep.mubr.bf16.mxu1 %v3306_v40  ;;  %v3308_v61 = vpack.c.bf16 %v3300_v20, %v3300_v20 }
 0x1f7   :  { %3738 = vmatmul.mubr.bf16.vlgmr.msra.gmra.mrb[48].mxu1 %v3305_v37 }
 0x1f8   :  { %3778 = vmatprep.mubr.bf16.mxu0 %v3308_v61  ;;  %4629 = vmatpush3.bf16.msra.mxu1 %v4628_v63  ;;  %v4254_v63 = vld [vmem:[%s6178_s10] ss:$0 sm:$0xff] }
 0x1f9   :  { %3779 = vmatmul.mubr.bf16.vlgmr.msra.gmra.mrb[48].mxu0 %v3307_v5  ;;  %4631 = vmatprep.subr.bf16.mxu1 %v4630_v32 }
 0x1fc   :  { %4633 = vmatpush3.bf16.msra.mxu1 %v4632_v44 }
 0x1fd   :  { %4635 = vmatprep.subr.bf16.mxu1 %v4634_v13 }
 0x200   :  { %4637 = vmatpush3.bf16.msra.mxu1 %v4636_v36 }
 0x201   :  { %4639 = vmatprep.subr.bf16.mxu1 %v4638_v54 }
 0x204   :  { %4641 = vmatpush3.bf16.msra.mxu1 %v4640_v48 }
 0x205   :  { %4643 = vmatprep.subr.bf16.mxu1 %v4642_v56 }
 0x208   :  { %4645 = vmatpush3.bf16.msra.mxu1 %v4644_v22 }
 0x209   :  { %4647 = vmatprep.subr.bf16.mxu1 %v4646_v30 }
 0x20c   :  { %4649 = vmatpush3.bf16.msra.mxu1 %v4648_v8 }
 0x20d   :  { %4651 = vmatprep.subr.bf16.mxu1 %v4650_v6 }
 0x210   :  { %4653 = vmatpush3.bf16.msra.mxu1 %v4652_v3 }
 0x211   :  { %4655 = vmatprep.subr.bf16.mxu1 %v4654_v23 }
 0x214   :  { %4657 = vmatpush3.bf16.msra.mxu1 %v4656_v35 }
 0x2ca   :  { %v3739_v42 = vpop.f32.mrb[48].mxu1 }
 0x2cb   :  { %v3740_v0 = vadd.f32 %v3739_v42, %v3378_v29  ;;  %v3741_v15 = vpop.f32.mrb[49].mxu1 }
 0x2cc   :  { %v3742_v33 = vadd.f32 %v3741_v15, %v3382_v2  ;;  %v3743_v51 = vpop.f32.mrb[50].mxu1  ;;  %v3780_v52 = vpop.f32.mrb[48].mxu0 }
 0x2cd   :  { %v3781_v60 = vadd.f32 %v3780_v52, %v3740_v0  ;;  %v3744_v25 = vpop.f32.mrb[51].mxu1  ;;  %v3782_v19 = vpop.f32.mrb[49].mxu0 }
 0x2ce   :  { %v3783_v27 = vadd.f32 %v3782_v19, %v3742_v33  ;;  %v3784_v47 = vpop.f32.mrb[50].mxu0 }
 0x2cf   :  { %v3785_v24 = vpop.f32.mrb[51].mxu0  ;;  %v3787_v40 = vmax.f32 %v3781_v60, 0.0 }
 0x2d0   :  { %v3788_v4 = vmax.f32 %v3783_v27, 0.0 }
 0x2d2   :  { %3892 = vmatprep.mubr.f32.mxu1 %v3788_v4 }
 0x2d3   :  { %3893 = vmatmul.mubr.f32.vlgmr.msra.gmra.mrb[52].mxu1 %v3787_v40 }
 0x3a6   :  { %v4623_v20 = vpop.f32.mrb[52].mxu1 }
 0x3a7   :  { %v4624_v37 = vpop.f32.mrb[53].mxu1 }
 0x3a8   :  { %v4625_v32 = vadd.f32 %v4624_v37, %v4623_v20 }
 0x3aa   :  { %v3895_v9 = vadd.f32 %v4625_v32, %v4254_v63 }
 0x3ac   :  { %3899 = vst.msk [vmem:[#allocation5] sm:$0x3] %vm3898_vm13, %v3895_v9 }
 0x3ad   :  { %4993 = shalt.err (!%p4990_p12)
}
 0x3ae   :  { %s4994_s22 = scalar_lea.hbm %s6179_s11, 32 }
 0x3af   :  { %p4995_p13 = scmp.ne.s32.totalorder %s6179_s11, %s4994_s22  ;;  %p4998_p0 = scmp.lt.u32.totalorder %s4994_s22, %s6179_s11 }
 0x3b1   :  { %p5000_p1 = pnand %p4998_p0, %p4995_p13 }
 0x3b3   :  { %5003 = shalt.err (!%p5000_p1)
}
 0x3b4   :  { %3909 = dma.vmem_to_hbm [thread:$0]  %s3907_s18, 32, %s6179_s11, [#allocation4]  }
 0x3b5   :  { %5006 = dma.done.wait [#allocation4], 32  }
 0x3b6   :  { %5007 = vsyncadd [#allocation4], 4294967264 }
 0x3b7   :  { %3913 = vsyncpa [#allocation3], 1 }
 0x3b8   :  { %3914 = vsyncpa [#allocation4], 1 }

</bundles_post_ra>
